<compile_context>
chip_gen: v7x
topology: tpu7x:2x2x1
jax: 0.10.0
libtpu: 0.0.40
codegen_flags: <defaults>
</compile_context>

<pallas_src>
import functools

import numpy as np
import jax
import jax.numpy as jnp
from jax import lax
from jax.experimental import pallas as pl
from jax.experimental.pallas import tpu as pltpu


def _tpu_config():
    """Generation-aware tile sizes / scoped-VMEM limit."""
    try:
        vmem_cap = int(pltpu.get_tpu_info().vmem_capacity_bytes)
    except Exception:
        vmem_cap = 128 * 1024 * 1024            # v5e/v6e default
    if vmem_cap <= 64 * 1024 * 1024:            # v7x-class: 64 MiB per TensorCore
        return dict(vmem_limit=40 * 1024 * 1024, tile_m=256, tile_n=256, tile_q=64)
    return dict(vmem_limit=64 * 1024 * 1024, tile_m=512, tile_n=512, tile_q=128)


_CFG = _tpu_config()


# ----------------------------- linear kernels ------------------------------

def _linear_kernel(x_ref, w_ref, b_ref, o_ref):
    # x: (tm, K), w: (K, tn) bf16, b: (1, tn) f32 -> o: (tm, tn) f32.
    x = x_ref[...].astype(jnp.bfloat16)
    o_ref[...] = jnp.dot(x, w_ref[...], preferred_element_type=jnp.float32) + b_ref[...]


def _linear(x2d, w_bf16, b_f32):
    M, K = x2d.shape
    _, N = w_bf16.shape
    tm = M if M <= _CFG["tile_m"] else _CFG["tile_m"]
    tn = N if N <= _CFG["tile_n"] else _CFG["tile_n"]
    grid = (pl.cdiv(M, tm), pl.cdiv(N, tn))
    return pl.pallas_call(
        _linear_kernel,
        out_shape=jax.ShapeDtypeStruct((M, N), jnp.float32),
        grid=grid,
        in_specs=[
            pl.BlockSpec((tm, K), lambda i, j: (i, 0)),
            pl.BlockSpec((K, tn), lambda i, j: (0, j)),
            pl.BlockSpec((1, tn), lambda i, j: (0, j)),
        ],
        out_specs=pl.BlockSpec((tm, tn), lambda i, j: (i, j)),
        compiler_params=pltpu.CompilerParams(
            dimension_semantics=("parallel", "parallel"),
            vmem_limit_bytes=_CFG["vmem_limit"],
        ),
    )(x2d, w_bf16, b_f32.reshape(1, N))


def _qkv_kernel(x_ref, w_ref, b_ref, o_ref):
    # x: (tm, K) f32, w: (1, K, E) bf16, b: (1, 1, E) f32 -> o: (1, tm, E) bf16.
    x = x_ref[...].astype(jnp.bfloat16)
    acc = jnp.dot(x, w_ref[0], preferred_element_type=jnp.float32) + b_ref[0]
    o_ref[0] = acc.astype(o_ref.dtype)


def _qkv_proj(x2d, w3_bf16, b3_f32):
    """Fused qkv projection: output (3, M, E) bf16 with q/k/v as contiguous slabs."""
    M, K = x2d.shape
    _, _, E = w3_bf16.shape
    tm = M if M <= _CFG["tile_m"] else _CFG["tile_m"]
    grid = (3, pl.cdiv(M, tm))
    return pl.pallas_call(
        _qkv_kernel,
        out_shape=jax.ShapeDtypeStruct((3, M, E), jnp.bfloat16),
        grid=grid,
        in_specs=[
            pl.BlockSpec((tm, K), lambda g, i: (i, 0)),
            pl.BlockSpec((1, K, E), lambda g, i: (g, 0, 0)),
            pl.BlockSpec((1, 1, E), lambda g, i: (g, 0, 0)),
        ],
        out_specs=pl.BlockSpec((1, tm, E), lambda g, i: (g, i, 0)),
        compiler_params=pltpu.CompilerParams(
            dimension_semantics=("parallel", "parallel"),
            vmem_limit_bytes=_CFG["vmem_limit"],
        ),
    )(x2d, w3_bf16, b3_f32)


# ---------------------------- attention kernel -----------------------------

def _attn_kernel(q_ref, k_ref, v_ref, o_ref, att_ref, energy_ref, *,
                 num_heads, head_dim, inv_scale):
    # One (batch, query-tile) pair per grid step; all heads processed per step so
    # `out` is written lane-dense in (tq, E) layout.  q/k/v arrive bf16 (no casts).
    q = q_ref[0, 0]                           # (tq, E)
    k = k_ref[0, 0]                           # (N,  E)
    v = v_ref[0, 0]                           # (N,  E)
    direct_store = head_dim % 128 == 0        # lane-aligned per-head stores?

    outs = []
    for h in range(num_heads):                # static unrolled loop over heads
        sl = slice(h * head_dim, (h + 1) * head_dim)
        qh = q[:, sl]                         # (tq, Dh)
        kh = k[:, sl]                         # (N,  Dh)
        vh = v[:, sl]                         # (N,  Dh)

        # energy = q @ k^T via dot_general (MXU-native transposed-RHS, no k.T copy)
        energy_h = lax.dot_general(
            qh, kh, (((1,), (1,)), ((), ())),
            preferred_element_type=jnp.float32)              # (tq, N) f32

        # softmax over keys (f32 accumulate), then /sqrt(emb_size) -- as the module.
        m = jnp.max(energy_h, axis=-1, keepdims=True)
        p = jnp.exp(energy_h - m)
        denom = jnp.sum(p, axis=-1, keepdims=True)
        att_h = p * (pl.reciprocal(denom, approx=True) * inv_scale)

        # dropout(p=0) is identity
        out_h = jnp.dot(att_h.astype(jnp.bfloat16), vh,
                        preferred_element_type=jnp.float32)  # (tq, Dh)

        energy_ref[0, h] = energy_h.astype(energy_ref.dtype)  # bf16 writeback
        att_ref[0, h] = att_h.astype(att_ref.dtype)           # bf16 writeback
        if direct_store:
            o_ref[0, :, sl] = out_h.astype(o_ref.dtype)
        else:
            outs.append(out_h)

    if not direct_store:
        o_ref[0] = jnp.concatenate(outs, axis=-1).astype(o_ref.dtype)  # (tq, E)


def _attention_core(qkv3, num_heads, emb_size):
    _, B, N, E = qkv3.shape
    head_dim = E // num_heads
    tq = N if N <= _CFG["tile_q"] else _CFG["tile_q"]
    inv_scale = 1.0 / (float(emb_size) ** 0.5)
    kernel = functools.partial(_attn_kernel, num_heads=num_heads,
                               head_dim=head_dim, inv_scale=inv_scale)
    grid = (B, pl.cdiv(N, tq))
    out, att, energy = pl.pallas_call(
        kernel,
        out_shape=(
            jax.ShapeDtypeStruct((B, N, E), jnp.bfloat16),
            jax.ShapeDtypeStruct((B, num_heads, N, N), jnp.bfloat16),
            jax.ShapeDtypeStruct((B, num_heads, N, N), jnp.bfloat16),
        ),
        grid=grid,
        in_specs=[
            # the fused (3,B,N,E) qkv array is passed three times; each BlockSpec
            # selects its slab (g = 0/1/2) in the index map -> no HBM slice copies.
            pl.BlockSpec((1, 1, tq, E), lambda b, qi: (0, b, qi, 0)),   # q tile
            pl.BlockSpec((1, 1, N, E), lambda b, qi: (1, b, 0, 0)),     # k resident
            pl.BlockSpec((1, 1, N, E), lambda b, qi: (2, b, 0, 0)),     # v resident
        ],
        out_specs=(
            pl.BlockSpec((1, tq, E), lambda b, qi: (b, qi, 0)),                  # out
            pl.BlockSpec((1, num_heads, tq, N), lambda b, qi: (b, 0, qi, 0)),    # att
            pl.BlockSpec((1, num_heads, tq, N), lambda b, qi: (b, 0, qi, 0)),    # energy
        ),
        compiler_params=pltpu.CompilerParams(
            dimension_semantics=("parallel", "parallel"),
            vmem_limit_bytes=_CFG["vmem_limit"],
        ),
    )(qkv3, qkv3, qkv3)
    return out, att, energy


# ----------------------------- module wrapper -------------------------------

def init_params(key, emb_size):
    k1, k2, k3, k4 = jax.random.split(key, 4)
    std = 0.02
    return {
        # stored as (in, out) so the kernels compute x @ W + b
        "qkv_w": std * jax.random.normal(k1, (emb_size, 3 * emb_size), jnp.float32),
        "qkv_b": std * jax.random.normal(k2, (3 * emb_size,), jnp.float32),
        "proj_w": std * jax.random.normal(k3, (emb_size, emb_size), jnp.float32),
        "proj_b": std * jax.random.normal(k4, (emb_size,), jnp.float32),
    }


def prepare_params(params, num_heads):
    """One-time (outside jit) weight prep: permute fused-qkv columns + cast bf16.

    Module column layout: c_old = h*(Dh*3) + d*3 + g  (innermost factor = qkv).
    New layout:           c_new = g*E + h*Dh + d.
    This weight-only shuffle replaces the whole-activation rearrange
    'b n (h d qkv) -> qkv b h n d' and runs exactly once (not per forward call).
    """
    E = params["proj_w"].shape[0]
    head_dim = E // num_heads
    g, h, d = np.meshgrid(np.arange(3), np.arange(num_heads), np.arange(head_dim),
                          indexing="ij")
    old_cols = (h * head_dim * 3 + d * 3 + g).reshape(-1)        # ordered by (g, h, d)
    qkv_w = np.asarray(params["qkv_w"], np.float32)
    qkv_b = np.asarray(params["qkv_b"], np.float32)
    w3 = qkv_w[:, old_cols].reshape(E, 3, E).transpose(1, 0, 2)  # (3, E_in, E_out)
    b3 = qkv_b[old_cols].reshape(3, 1, E)
    return {
        "qkv_w3": jnp.asarray(w3, jnp.bfloat16),    # MXU operand dtype, cast once
        "qkv_b3": jnp.asarray(b3, jnp.float32),     # added to f32 accumulator
        "proj_w": jnp.asarray(params["proj_w"], jnp.bfloat16),
        "proj_b": jnp.asarray(params["proj_b"], jnp.float32),
    }


def multi_head_attention(prepared, x, num_heads):
    """Self-attention (cross=False, mask=None) forward pass."""
    B, N, E = x.shape

    # fused qkv projection (Pallas); q/k/v come out as contiguous bf16 slabs already
    # in 'b n (h d)' column order -> no activation transpose needed.
    qkv = _qkv_proj(x.reshape(B * N, E), prepared["qkv_w3"], prepared["qkv_b3"])
    qkv = qkv.reshape(3, B, N, E)             # free reshape; no per-slab HBM slicing

    # fused attention core (Pallas): out already in (B, N, E) = 'b n (h d)' layout.
    out, att_inter, energy = _attention_core(qkv, num_heads, E)

    # output projection (Pallas matmul), f32 result
    out = _linear(out.reshape(B * N, E), prepared["proj_w"], prepared["proj_b"])
    return out.reshape(B, N, E), att_inter, energy


# ------------------------------- reference ----------------------------------

def _reference(params, x, num_heads):
    B, N, E = x.shape
    H = num_heads
    Dh = E // H
    qkv = x @ params["qkv_w"] + params["qkv_b"]
    qkv = qkv.reshape(B, N, H, Dh, 3)
    qkv = jnp.transpose(qkv, (4, 0, 2, 1, 3))
    q, k, v = qkv[0], qkv[1], qkv[2]
    energy = jnp.einsum("bhqd,bhkd->bhqk", q, k)
    att = jax.nn.softmax(energy, axis=-1) / (E ** 0.5)
    out = jnp.einsum("bhal,bhlv->bhav", att, v)
    out = jnp.transpose(out, (0, 2, 1, 3)).reshape(B, N, E)
    out = out @ params["proj_w"] + params["proj_b"]
    return out, att, energy


# --------------------------------- main --------------------------------------

if __name__ == "__main__":
    EMB, HEADS, BATCH, SEQ = 32, 8, 2, 8

    key = jax.random.PRNGKey(0)
    pkey, xkey = jax.random.split(key)
    params = init_params(pkey, EMB)
    prepared = prepare_params(params, HEADS)   # weight permute/cast hoisted out of jit
    x = jax.random.normal(xkey, (BATCH, SEQ, EMB), jnp.float32)

    fwd = jax.jit(functools.partial(multi_head_attention, num_heads=HEADS))
    out, att, energy = fwd(prepared, x)
    jax.block_until_ready((out, att, energy))

    r_out, r_att, r_energy = _reference(params, x, HEADS)
    # bf16 MXU operands + bf16 att/energy storage + approx reciprocal -> loose compare.
    assert jnp.allclose(out, r_out, atol=3e-2, rtol=3e-2)
    assert jnp.allclose(att.astype(jnp.float32), r_att, atol=3e-2, rtol=3e-2)
    assert jnp.allclose(energy.astype(jnp.float32), r_energy, atol=3e-2, rtol=3e-2)

    print("KERNEL_OK")
</pallas_src>

<mosaic_0001>
module attributes {stable_mosaic.version = 11 : i64} {
  func.func @_linear_kernel(%arg0: i32, %arg1: i32, %arg2: memref<16x32xbf16, #tpu.memory_space<vmem>>, %arg3: memref<32x32xbf16, #tpu.memory_space<vmem>>, %arg4: memref<1x32xf32, #tpu.memory_space<vmem>>, %arg5: memref<16x32xf32, #tpu.memory_space<vmem>>) attributes {dimension_semantics = [#tpu.dimension_semantics<parallel>, #tpu.dimension_semantics<parallel>], iteration_bounds = array<i64: 1, 1>, scalar_prefetch = 0 : i64, scratch_operands = 0 : i64, tpu.core_type = #tpu.core_type<tc>, window_params = [{transform_indices = @transform_0, window_bounds = array<i64: 16, 32>}, {transform_indices = @transform_1, window_bounds = array<i64: 32, 32>}, {transform_indices = @transform_2, window_bounds = array<i64: 1, 32>}, {transform_indices = @transform_3, window_bounds = array<i64: 16, 32>}]} {
    %c0 = arith.constant 0 : index
    %c0_0 = arith.constant 0 : index
    %0 = vector.load %arg2[%c0, %c0_0] : memref<16x32xbf16, #tpu.memory_space<vmem>>, vector<16x32xbf16>
    %c0_1 = arith.constant 0 : index
    %c0_2 = arith.constant 0 : index
    %1 = vector.load %arg3[%c0_1, %c0_2] : memref<32x32xbf16, #tpu.memory_space<vmem>>, vector<32x32xbf16>
    %cst = arith.constant dense<0.000000e+00> : vector<16x32xf32>
    %2 = tpu.matmul %0, %1, %cst {dimension_numbers = #tpu.dot_dimension_numbers<[1], [0], [0], [1], [0, 0, 1, 1], [], []>} : vector<16x32xbf16>, vector<32x32xbf16>, vector<16x32xf32> -> vector<16x32xf32>
    %c0_3 = arith.constant 0 : index
    %c0_4 = arith.constant 0 : index
    %3 = vector.load %arg4[%c0_3, %c0_4] : memref<1x32xf32, #tpu.memory_space<vmem>>, vector<1x32xf32>
    %4 = vector.broadcast %3 : vector<1x32xf32> to vector<16x32xf32>
    %5 = arith.addf %2, %4 : vector<16x32xf32>
    %c0_5 = arith.constant 0 : index
    %c0_6 = arith.constant 0 : index
    %6 = vector.load %arg5[%c0_5, %c0_6] : memref<16x32xf32, #tpu.memory_space<vmem>>, vector<16x32xf32>
    tpu.vector_store %arg5[%c0_5, %c0_6], %5 {strides = array<i32>} : memref<16x32xf32, #tpu.memory_space<vmem>>, vector<16x32xf32>,
    return
  }
  func.func @transform_0(%arg0: i32, %arg1: i32) -> (i32, i32) {
    %c0_i32 = arith.constant 0 : i32
    %c0_i32_0 = arith.constant 0 : i32
    return %arg0, %c0_i32 : i32, i32
  }
  func.func @transform_1(%arg0: i32, %arg1: i32) -> (i32, i32) {
    %c0_i32 = arith.constant 0 : i32
    %c0_i32_0 = arith.constant 0 : i32
    return %c0_i32, %arg1 : i32, i32
  }
  func.func @transform_2(%arg0: i32, %arg1: i32) -> (i32, i32) {
    %c0_i32 = arith.constant 0 : i32
    %c0_i32_0 = arith.constant 0 : i32
    return %c0_i32, %arg1 : i32, i32
  }
  func.func @transform_3(%arg0: i32, %arg1: i32) -> (i32, i32) {
    %c0_i32 = arith.constant 0 : i32
    return %arg0, %arg1 : i32, i32
  }
}

module attributes {stable_mosaic.version = 11 : i64} {
  func.func @_qkv_kernel(%arg0: i32, %arg1: i32, %arg2: memref<16x32xf32, #tpu.memory_space<vmem>>, %arg3: memref<1x32x32xbf16, #tpu.memory_space<vmem>>, %arg4: memref<1x1x32xf32, #tpu.memory_space<vmem>>, %arg5: memref<1x16x32xbf16, #tpu.memory_space<vmem>>) attributes {dimension_semantics = [#tpu.dimension_semantics<parallel>, #tpu.dimension_semantics<parallel>], iteration_bounds = array<i64: 3, 1>, scalar_prefetch = 0 : i64, scratch_operands = 0 : i64, tpu.core_type = #tpu.core_type<tc>, window_params = [{transform_indices = @transform_0, window_bounds = array<i64: 16, 32>}, {transform_indices = @transform_1, window_bounds = array<i64: 1, 32, 32>}, {transform_indices = @transform_2, window_bounds = array<i64: 1, 1, 32>}, {transform_indices = @transform_3, window_bounds = array<i64: 1, 16, 32>}]} {
    %c0 = arith.constant 0 : index
    %c0_0 = arith.constant 0 : index
    %0 = vector.load %arg2[%c0, %c0_0] : memref<16x32xf32, #tpu.memory_space<vmem>>, vector<16x32xf32>
    %1 = arith.truncf %0 : vector<16x32xf32> to vector<16x32xbf16>
    %c0_1 = arith.constant 0 : index
    %c0_2 = arith.constant 0 : index
    %c0_3 = arith.constant 0 : index
    %2 = vector.load %arg3[%c0_1, %c0_2, %c0_3] : memref<1x32x32xbf16, #tpu.memory_space<vmem>>, vector<1x32x32xbf16>
    %3 = vector.shape_cast %2 : vector<1x32x32xbf16> to vector<32x32xbf16>
    %cst = arith.constant dense<0.000000e+00> : vector<16x32xf32>
    %4 = tpu.matmul %1, %3, %cst {dimension_numbers = #tpu.dot_dimension_numbers<[1], [0], [0], [1], [0, 0, 1, 1], [], []>} : vector<16x32xbf16>, vector<32x32xbf16>, vector<16x32xf32> -> vector<16x32xf32>
    %c0_4 = arith.constant 0 : index
    %c0_5 = arith.constant 0 : index
    %c0_6 = arith.constant 0 : index
    %5 = vector.load %arg4[%c0_4, %c0_5, %c0_6] : memref<1x1x32xf32, #tpu.memory_space<vmem>>, vector<1x1x32xf32>
    %6 = vector.shape_cast %5 : vector<1x1x32xf32> to vector<1x32xf32>
    %7 = vector.broadcast %6 : vector<1x32xf32> to vector<16x32xf32>
    %8 = arith.addf %4, %7 : vector<16x32xf32>
    %9 = arith.truncf %8 : vector<16x32xf32> to vector<16x32xbf16>
    %c0_7 = arith.constant 0 : index
    %c0_8 = arith.constant 0 : index
    %c0_9 = arith.constant 0 : index
    %10 = vector.load %arg5[%c0_7, %c0_8, %c0_9] : memref<1x16x32xbf16, #tpu.memory_space<vmem>>, vector<1x16x32xbf16>
    %11 = vector.shape_cast %10 : vector<1x16x32xbf16> to vector<16x32xbf16>
    %12 = vector.shape_cast %9 : vector<16x32xbf16> to vector<1x16x32xbf16>
    tpu.vector_store %arg5[%c0_7, %c0_8, %c0_9], %12 {strides = array<i32>} : memref<1x16x32xbf16, #tpu.memory_space<vmem>>, vector<1x16x32xbf16>,
    return
  }
  func.func @transform_0(%arg0: i32, %arg1: i32) -> (i32, i32) {
    %c0_i32 = arith.constant 0 : i32
    %c0_i32_0 = arith.constant 0 : i32
    return %arg1, %c0_i32 : i32, i32
  }
  func.func @transform_1(%arg0: i32, %arg1: i32) -> (i32, i32, i32) {
    %c0_i32 = arith.constant 0 : i32
    %c0_i32_0 = arith.constant 0 : i32
    %c0_i32_1 = arith.constant 0 : i32
    return %arg0, %c0_i32, %c0_i32_0 : i32, i32, i32
  }
  func.func @transform_2(%arg0: i32, %arg1: i32) -> (i32, i32, i32) {
    %c0_i32 = arith.constant 0 : i32
    %c0_i32_0 = arith.constant 0 : i32
    %c0_i32_1 = arith.constant 0 : i32
    return %arg0, %c0_i32, %c0_i32_0 : i32, i32, i32
  }
  func.func @transform_3(%arg0: i32, %arg1: i32) -> (i32, i32, i32) {
    %c0_i32 = arith.constant 0 : i32
    %c0_i32_0 = arith.constant 0 : i32
    return %arg0, %arg1, %c0_i32 : i32, i32, i32
  }
}

module attributes {stable_mosaic.version = 11 : i64} {
  func.func @_attn_kernel(%arg0: i32, %arg1: i32, %arg2: memref<1x1x8x32xbf16, #tpu.memory_space<vmem>>, %arg3: memref<1x1x8x32xbf16, #tpu.memory_space<vmem>>, %arg4: memref<1x1x8x32xbf16, #tpu.memory_space<vmem>>, %arg5: memref<1x8x32xbf16, #tpu.memory_space<vmem>>, %arg6: memref<1x8x8x8xbf16, #tpu.memory_space<vmem>>, %arg7: memref<1x8x8x8xbf16, #tpu.memory_space<vmem>>) attributes {dimension_semantics = [#tpu.dimension_semantics<parallel>, #tpu.dimension_semantics<parallel>], iteration_bounds = array<i64: 2, 1>, scalar_prefetch = 0 : i64, scratch_operands = 0 : i64, tpu.core_type = #tpu.core_type<tc>, window_params = [{transform_indices = @transform_0, window_bounds = array<i64: 1, 1, 8, 32>}, {transform_indices = @transform_1, window_bounds = array<i64: 1, 1, 8, 32>}, {transform_indices = @transform_2, window_bounds = array<i64: 1, 1, 8, 32>}, {transform_indices = @transform_3, window_bounds = array<i64: 1, 8, 32>}, {transform_indices = @transform_4, window_bounds = array<i64: 1, 8, 8, 8>}, {transform_indices = @transform_5, window_bounds = array<i64: 1, 8, 8, 8>}]} {
    %c0 = arith.constant 0 : index
    %c0_0 = arith.constant 0 : index
    %c0_1 = arith.constant 0 : index
    %c0_2 = arith.constant 0 : index
    %0 = vector.load %arg2[%c0, %c0_0, %c0_1, %c0_2] : memref<1x1x8x32xbf16, #tpu.memory_space<vmem>>, vector<1x1x8x32xbf16>
    %1 = vector.shape_cast %0 : vector<1x1x8x32xbf16> to vector<8x32xbf16>
    %c0_3 = arith.constant 0 : index
    %c0_4 = arith.constant 0 : index
    %c0_5 = arith.constant 0 : index
    %c0_6 = arith.constant 0 : index
    %2 = vector.load %arg3[%c0_3, %c0_4, %c0_5, %c0_6] : memref<1x1x8x32xbf16, #tpu.memory_space<vmem>>, vector<1x1x8x32xbf16>
    %3 = vector.shape_cast %2 : vector<1x1x8x32xbf16> to vector<8x32xbf16>
    %c0_7 = arith.constant 0 : index
    %c0_8 = arith.constant 0 : index
    %c0_9 = arith.constant 0 : index
    %c0_10 = arith.constant 0 : index
    %4 = vector.load %arg4[%c0_7, %c0_8, %c0_9, %c0_10] : memref<1x1x8x32xbf16, #tpu.memory_space<vmem>>, vector<1x1x8x32xbf16>
    %5 = vector.shape_cast %4 : vector<1x1x8x32xbf16> to vector<8x32xbf16>
    %6 = vector.extract_strided_slice %1 {offsets = [0, 0], sizes = [8, 4], strides = [1, 1]} : vector<8x32xbf16> to vector<8x4xbf16>
    %7 = vector.extract_strided_slice %3 {offsets = [0, 0], sizes = [8, 4], strides = [1, 1]} : vector<8x32xbf16> to vector<8x4xbf16>
    %8 = vector.extract_strided_slice %5 {offsets = [0, 0], sizes = [8, 4], strides = [1, 1]} : vector<8x32xbf16> to vector<8x4xbf16>
    %cst = arith.constant dense<0.000000e+00> : vector<8x8xf32>
    %9 = tpu.matmul %6, %7, %cst {dimension_numbers = #tpu.dot_dimension_numbers<[1], [1], [0], [0], [0, 0, 1, 0], [], []>} : vector<8x4xbf16>, vector<8x4xbf16>, vector<8x8xf32> -> vector<8x8xf32>
    %cst_11 = arith.constant dense<0xFF800000> : vector<8xf32>
    %10 = vector.multi_reduction <maximumf>, %9, %cst_11 [1] : vector<8x8xf32> to vector<8xf32>
    %11 = vector.shape_cast %10 : vector<8xf32> to vector<8x1xf32>
    %12 = vector.broadcast %11 : vector<8x1xf32> to vector<8x8xf32>
    %13 = arith.subf %9, %12 : vector<8x8xf32>
    %14 = math.exp %13 : vector<8x8xf32>
    %cst_12 = arith.constant dense<0.000000e+00> : vector<8xf32>
    %15 = vector.multi_reduction <add>, %14, %cst_12 [1] : vector<8x8xf32> to vector<8xf32>
    %16 = vector.shape_cast %15 : vector<8xf32> to vector<8x1xf32>
    %17 = tpu.reciprocal %16 {approx = true} : vector<8x1xf32> -> vector<8x1xf32>
    %cst_13 = arith.constant 0.176776692 : f32
    %18 = vector.broadcast %cst_13 : f32 to vector<8x1xf32>
    %19 = arith.mulf %17, %18 : vector<8x1xf32>
    %20 = vector.broadcast %19 : vector<8x1xf32> to vector<8x8xf32>
    %21 = arith.mulf %14, %20 : vector<8x8xf32>
    %22 = arith.truncf %21 : vector<8x8xf32> to vector<8x8xbf16>
    %cst_14 = arith.constant dense<0.000000e+00> : vector<8x4xf32>
    %23 = tpu.matmul %22, %8, %cst_14 {dimension_numbers = #tpu.dot_dimension_numbers<[1], [0], [0], [1], [0, 0, 1, 1], [], []>} : vector<8x8xbf16>, vector<8x4xbf16>, vector<8x4xf32> -> vector<8x4xf32>
    %24 = arith.truncf %9 : vector<8x8xf32> to vector<8x8xbf16>
    %c0_15 = arith.constant 0 : index
    %c0_16 = arith.constant 0 : index
    %c0_17 = arith.constant 0 : index
    %c0_18 = arith.constant 0 : index
    %25 = vector.load %arg7[%c0_15, %c0_16, %c0_17, %c0_18] : memref<1x8x8x8xbf16, #tpu.memory_space<vmem>>, vector<1x1x8x8xbf16>
    %26 = vector.shape_cast %25 : vector<1x1x8x8xbf16> to vector<8x8xbf16>
    %27 = vector.shape_cast %24 : vector<8x8xbf16> to vector<1x1x8x8xbf16>
    tpu.vector_store %arg7[%c0_15, %c0_16, %c0_17, %c0_18], %27 {strides = array<i32>} : memref<1x8x8x8xbf16, #tpu.memory_space<vmem>>, vector<1x1x8x8xbf16>,
    %28 = arith.truncf %21 : vector<8x8xf32> to vector<8x8xbf16>
    %c0_19 = arith.constant 0 : index
    %c0_20 = arith.constant 0 : index
    %c0_21 = arith.constant 0 : index
    %c0_22 = arith.constant 0 : index
    %29 = vector.load %arg6[%c0_19, %c0_20, %c0_21, %c0_22] : memref<1x8x8x8xbf16, #tpu.memory_space<vmem>>, vector<1x1x8x8xbf16>
    %30 = vector.shape_cast %29 : vector<1x1x8x8xbf16> to vector<8x8xbf16>
    %31 = vector.shape_cast %28 : vector<8x8xbf16> to vector<1x1x8x8xbf16>
    tpu.vector_store %arg6[%c0_19, %c0_20, %c0_21, %c0_22], %31 {strides = array<i32>} : memref<1x8x8x8xbf16, #tpu.memory_space<vmem>>, vector<1x1x8x8xbf16>,
    %32 = vector.extract_strided_slice %1 {offsets = [0, 4], sizes = [8, 4], strides = [1, 1]} : vector<8x32xbf16> to vector<8x4xbf16>
    %33 = vector.extract_strided_slice %3 {offsets = [0, 4], sizes = [8, 4], strides = [1, 1]} : vector<8x32xbf16> to vector<8x4xbf16>
    %34 = vector.extract_strided_slice %5 {offsets = [0, 4], sizes = [8, 4], strides = [1, 1]} : vector<8x32xbf16> to vector<8x4xbf16>
    %cst_23 = arith.constant dense<0.000000e+00> : vector<8x8xf32>
    %35 = tpu.matmul %32, %33, %cst_23 {dimension_numbers = #tpu.dot_dimension_numbers<[1], [1], [0], [0], [0, 0, 1, 0], [], []>} : vector<8x4xbf16>, vector<8x4xbf16>, vector<8x8xf32> -> vector<8x8xf32>
    %cst_24 = arith.constant dense<0xFF800000> : vector<8xf32>
    %36 = vector.multi_reduction <maximumf>, %35, %cst_24 [1] : vector<8x8xf32> to vector<8xf32>
    %37 = vector.shape_cast %36 : vector<8xf32> to vector<8x1xf32>
    %38 = vector.broadcast %37 : vector<8x1xf32> to vector<8x8xf32>
    %39 = arith.subf %35, %38 : vector<8x8xf32>
    %40 = math.exp %39 : vector<8x8xf32>
    %cst_25 = arith.constant dense<0.000000e+00> : vector<8xf32>
    %41 = vector.multi_reduction <add>, %40, %cst_25 [1] : vector<8x8xf32> to vector<8xf32>
    %42 = vector.shape_cast %41 : vector<8xf32> to vector<8x1xf32>
    %43 = tpu.reciprocal %42 {approx = true} : vector<8x1xf32> -> vector<8x1xf32>
    %cst_26 = arith.constant 0.176776692 : f32
    %44 = vector.broadcast %cst_26 : f32 to vector<8x1xf32>
    %45 = arith.mulf %43, %44 : vector<8x1xf32>
    %46 = vector.broadcast %45 : vector<8x1xf32> to vector<8x8xf32>
    %47 = arith.mulf %40, %46 : vector<8x8xf32>
    %48 = arith.truncf %47 : vector<8x8xf32> to vector<8x8xbf16>
    %cst_27 = arith.constant dense<0.000000e+00> : vector<8x4xf32>
    %49 = tpu.matmul %48, %34, %cst_27 {dimension_numbers = #tpu.dot_dimension_numbers<[1], [0], [0], [1], [0, 0, 1, 1], [], []>} : vector<8x8xbf16>, vector<8x4xbf16>, vector<8x4xf32> -> vector<8x4xf32>
    %50 = arith.truncf %35 : vector<8x8xf32> to vector<8x8xbf16>
    %c0_28 = arith.constant 0 : index
    %c1 = arith.constant 1 : index
    %c0_29 = arith.constant 0 : index
    %c0_30 = arith.constant 0 : index
    %51 = vector.load %arg7[%c0_28, %c1, %c0_29, %c0_30] : memref<1x8x8x8xbf16, #tpu.memory_space<vmem>>, vector<1x1x8x8xbf16>
    %52 = vector.shape_cast %51 : vector<1x1x8x8xbf16> to vector<8x8xbf16>
    %53 = vector.shape_cast %50 : vector<8x8xbf16> to vector<1x1x8x8xbf16>
    tpu.vector_store %arg7[%c0_28, %c1, %c0_29, %c0_30], %53 {strides = array<i32>} : memref<1x8x8x8xbf16, #tpu.memory_space<vmem>>, vector<1x1x8x8xbf16>,
    %54 = arith.truncf %47 : vector<8x8xf32> to vector<8x8xbf16>
    %c0_31 = arith.constant 0 : index
    %c1_32 = arith.constant 1 : index
    %c0_33 = arith.constant 0 : index
    %c0_34 = arith.constant 0 : index
    %55 = vector.load %arg6[%c0_31, %c1_32, %c0_33, %c0_34] : memref<1x8x8x8xbf16, #tpu.memory_space<vmem>>, vector<1x1x8x8xbf16>
    %56 = vector.shape_cast %55 : vector<1x1x8x8xbf16> to vector<8x8xbf16>
    %57 = vector.shape_cast %54 : vector<8x8xbf16> to vector<1x1x8x8xbf16>
    tpu.vector_store %arg6[%c0_31, %c1_32, %c0_33, %c0_34], %57 {strides = array<i32>} : memref<1x8x8x8xbf16, #tpu.memory_space<vmem>>, vector<1x1x8x8xbf16>,
    %58 = vector.extract_strided_slice %1 {offsets = [0, 8], sizes = [8, 4], strides = [1, 1]} : vector<8x32xbf16> to vector<8x4xbf16>
    %59 = vector.extract_strided_slice %3 {offsets = [0, 8], sizes = [8, 4], strides = [1, 1]} : vector<8x32xbf16> to vector<8x4xbf16>
    %60 = vector.extract_strided_slice %5 {offsets = [0, 8], sizes = [8, 4], strides = [1, 1]} : vector<8x32xbf16> to vector<8x4xbf16>
    %cst_35 = arith.constant dense<0.000000e+00> : vector<8x8xf32>
    %61 = tpu.matmul %58, %59, %cst_35 {dimension_numbers = #tpu.dot_dimension_numbers<[1], [1], [0], [0], [0, 0, 1, 0], [], []>} : vector<8x4xbf16>, vector<8x4xbf16>, vector<8x8xf32> -> vector<8x8xf32>
    %cst_36 = arith.constant dense<0xFF800000> : vector<8xf32>
    %62 = vector.multi_reduction <maximumf>, %61, %cst_36 [1] : vector<8x8xf32> to vector<8xf32>
    %63 = vector.shape_cast %62 : vector<8xf32> to vector<8x1xf32>
    %64 = vector.broadcast %63 : vector<8x1xf32> to vector<8x8xf32>
    %65 = arith.subf %61, %64 : vector<8x8xf32>
    %66 = math.exp %65 : vector<8x8xf32>
    %cst_37 = arith.constant dense<0.000000e+00> : vector<8xf32>
    %67 = vector.multi_reduction <add>, %66, %cst_37 [1] : vector<8x8xf32> to vector<8xf32>
    %68 = vector.shape_cast %67 : vector<8xf32> to vector<8x1xf32>
    %69 = tpu.reciprocal %68 {approx = true} : vector<8x1xf32> -> vector<8x1xf32>
    %cst_38 = arith.constant 0.176776692 : f32
    %70 = vector.broadcast %cst_38 : f32 to vector<8x1xf32>
    %71 = arith.mulf %69, %70 : vector<8x1xf32>
    %72 = vector.broadcast %71 : vector<8x1xf32> to vector<8x8xf32>
    %73 = arith.mulf %66, %72 : vector<8x8xf32>
    %74 = arith.truncf %73 : vector<8x8xf32> to vector<8x8xbf16>
    %cst_39 = arith.constant dense<0.000000e+00> : vector<8x4xf32>
    %75 = tpu.matmul %74, %60, %cst_39 {dimension_numbers = #tpu.dot_dimension_numbers<[1], [0], [0], [1], [0, 0, 1, 1], [], []>} : vector<8x8xbf16>, vector<8x4xbf16>, vector<8x4xf32> -> vector<8x4xf32>
    %76 = arith.truncf %61 : vector<8x8xf32> to vector<8x8xbf16>
    %c0_40 = arith.constant 0 : index
    %c2 = arith.constant 2 : index
    %c0_41 = arith.constant 0 : index
    %c0_42 = arith.constant 0 : index
    %77 = vector.load %arg7[%c0_40, %c2, %c0_41, %c0_42] : memref<1x8x8x8xbf16, #tpu.memory_space<vmem>>, vector<1x1x8x8xbf16>
    %78 = vector.shape_cast %77 : vector<1x1x8x8xbf16> to vector<8x8xbf16>
    %79 = vector.shape_cast %76 : vector<8x8xbf16> to vector<1x1x8x8xbf16>
    tpu.vector_store %arg7[%c0_40, %c2, %c0_41, %c0_42], %79 {strides = array<i32>} : memref<1x8x8x8xbf16, #tpu.memory_space<vmem>>, vector<1x1x8x8xbf16>,
    %80 = arith.truncf %73 : vector<8x8xf32> to vector<8x8xbf16>
    %c0_43 = arith.constant 0 : index
    %c2_44 = arith.constant 2 : index
    %c0_45 = arith.constant 0 : index
    %c0_46 = arith.constant 0 : index
    %81 = vector.load %arg6[%c0_43, %c2_44, %c0_45, %c0_46] : memref<1x8x8x8xbf16, #tpu.memory_space<vmem>>, vector<1x1x8x8xbf16>
    %82 = vector.shape_cast %81 : vector<1x1x8x8xbf16> to vector<8x8xbf16>
    %83 = vector.shape_cast %80 : vector<8x8xbf16> to vector<1x1x8x8xbf16>
    tpu.vector_store %arg6[%c0_43, %c2_44, %c0_45, %c0_46], %83 {strides = array<i32>} : memref<1x8x8x8xbf16, #tpu.memory_space<vmem>>, vector<1x1x8x8xbf16>,
    %84 = vector.extract_strided_slice %1 {offsets = [0, 12], sizes = [8, 4], strides = [1, 1]} : vector<8x32xbf16> to vector<8x4xbf16>
    %85 = vector.extract_strided_slice %3 {offsets = [0, 12], sizes = [8, 4], strides = [1, 1]} : vector<8x32xbf16> to vector<8x4xbf16>
    %86 = vector.extract_strided_slice %5 {offsets = [0, 12], sizes = [8, 4], strides = [1, 1]} : vector<8x32xbf16> to vector<8x4xbf16>
    %cst_47 = arith.constant dense<0.000000e+00> : vector<8x8xf32>
    %87 = tpu.matmul %84, %85, %cst_47 {dimension_numbers = #tpu.dot_dimension_numbers<[1], [1], [0], [0], [0, 0, 1, 0], [], []>} : vector<8x4xbf16>, vector<8x4xbf16>, vector<8x8xf32> -> vector<8x8xf32>
    %cst_48 = arith.constant dense<0xFF800000> : vector<8xf32>
    %88 = vector.multi_reduction <maximumf>, %87, %cst_48 [1] : vector<8x8xf32> to vector<8xf32>
    %89 = vector.shape_cast %88 : vector<8xf32> to vector<8x1xf32>
    %90 = vector.broadcast %89 : vector<8x1xf32> to vector<8x8xf32>
    %91 = arith.subf %87, %90 : vector<8x8xf32>
    %92 = math.exp %91 : vector<8x8xf32>
    %cst_49 = arith.constant dense<0.000000e+00> : vector<8xf32>
    %93 = vector.multi_reduction <add>, %92, %cst_49 [1] : vector<8x8xf32> to vector<8xf32>
    %94 = vector.shape_cast %93 : vector<8xf32> to vector<8x1xf32>
    %95 = tpu.reciprocal %94 {approx = true} : vector<8x1xf32> -> vector<8x1xf32>
    %cst_50 = arith.constant 0.176776692 : f32
    %96 = vector.broadcast %cst_50 : f32 to vector<8x1xf32>
    %97 = arith.mulf %95, %96 : vector<8x1xf32>
    %98 = vector.broadcast %97 : vector<8x1xf32> to vector<8x8xf32>
    %99 = arith.mulf %92, %98 : vector<8x8xf32>
    %100 = arith.truncf %99 : vector<8x8xf32> to vector<8x8xbf16>
    %cst_51 = arith.constant dense<0.000000e+00> : vector<8x4xf32>
    %101 = tpu.matmul %100, %86, %cst_51 {dimension_numbers = #tpu.dot_dimension_numbers<[1], [0], [0], [1], [0, 0, 1, 1], [], []>} : vector<8x8xbf16>, vector<8x4xbf16>, vector<8x4xf32> -> vector<8x4xf32>
    %102 = arith.truncf %87 : vector<8x8xf32> to vector<8x8xbf16>
    %c0_52 = arith.constant 0 : index
    %c3 = arith.constant 3 : index
    %c0_53 = arith.constant 0 : index
    %c0_54 = arith.constant 0 : index
    %103 = vector.load %arg7[%c0_52, %c3, %c0_53, %c0_54] : memref<1x8x8x8xbf16, #tpu.memory_space<vmem>>, vector<1x1x8x8xbf16>
    %104 = vector.shape_cast %103 : vector<1x1x8x8xbf16> to vector<8x8xbf16>
    %105 = vector.shape_cast %102 : vector<8x8xbf16> to vector<1x1x8x8xbf16>
    tpu.vector_store %arg7[%c0_52, %c3, %c0_53, %c0_54], %105 {strides = array<i32>} : memref<1x8x8x8xbf16, #tpu.memory_space<vmem>>, vector<1x1x8x8xbf16>,
    %106 = arith.truncf %99 : vector<8x8xf32> to vector<8x8xbf16>
    %c0_55 = arith.constant 0 : index
    %c3_56 = arith.constant 3 : index
    %c0_57 = arith.constant 0 : index
    %c0_58 = arith.constant 0 : index
    %107 = vector.load %arg6[%c0_55, %c3_56, %c0_57, %c0_58] : memref<1x8x8x8xbf16, #tpu.memory_space<vmem>>, vector<1x1x8x8xbf16>
    %108 = vector.shape_cast %107 : vector<1x1x8x8xbf16> to vector<8x8xbf16>
    %109 = vector.shape_cast %106 : vector<8x8xbf16> to vector<1x1x8x8xbf16>
    tpu.vector_store %arg6[%c0_55, %c3_56, %c0_57, %c0_58], %109 {strides = array<i32>} : memref<1x8x8x8xbf16, #tpu.memory_space<vmem>>, vector<1x1x8x8xbf16>,
    %110 = vector.extract_strided_slice %1 {offsets = [0, 16], sizes = [8, 4], strides = [1, 1]} : vector<8x32xbf16> to vector<8x4xbf16>
    %111 = vector.extract_strided_slice %3 {offsets = [0, 16], sizes = [8, 4], strides = [1, 1]} : vector<8x32xbf16> to vector<8x4xbf16>
    %112 = vector.extract_strided_slice %5 {offsets = [0, 16], sizes = [8, 4], strides = [1, 1]} : vector<8x32xbf16> to vector<8x4xbf16>
    %cst_59 = arith.constant dense<0.000000e+00> : vector<8x8xf32>
    %113 = tpu.matmul %110, %111, %cst_59 {dimension_numbers = #tpu.dot_dimension_numbers<[1], [1], [0], [0], [0, 0, 1, 0], [], []>} : vector<8x4xbf16>, vector<8x4xbf16>, vector<8x8xf32> -> vector<8x8xf32>
    %cst_60 = arith.constant dense<0xFF800000> : vector<8xf32>
    %114 = vector.multi_reduction <maximumf>, %113, %cst_60 [1] : vector<8x8xf32> to vector<8xf32>
    %115 = vector.shape_cast %114 : vector<8xf32> to vector<8x1xf32>
    %116 = vector.broadcast %115 : vector<8x1xf32> to vector<8x8xf32>
    %117 = arith.subf %113, %116 : vector<8x8xf32>
    %118 = math.exp %117 : vector<8x8xf32>
    %cst_61 = arith.constant dense<0.000000e+00> : vector<8xf32>
    %119 = vector.multi_reduction <add>, %118, %cst_61 [1] : vector<8x8xf32> to vector<8xf32>
    %120 = vector.shape_cast %119 : vector<8xf32> to vector<8x1xf32>
    %121 = tpu.reciprocal %120 {approx = true} : vector<8x1xf32> -> vector<8x1xf32>
    %cst_62 = arith.constant 0.176776692 : f32
    %122 = vector.broadcast %cst_62 : f32 to vector<8x1xf32>
    %123 = arith.mulf %121, %122 : vector<8x1xf32>
    %124 = vector.broadcast %123 : vector<8x1xf32> to vector<8x8xf32>
    %125 = arith.mulf %118, %124 : vector<8x8xf32>
    %126 = arith.truncf %125 : vector<8x8xf32> to vector<8x8xbf16>
    %cst_63 = arith.constant dense<0.000000e+00> : vector<8x4xf32>
    %127 = tpu.matmul %126, %112, %cst_63 {dimension_numbers = #tpu.dot_dimension_numbers<[1], [0], [0], [1], [0, 0, 1, 1], [], []>} : vector<8x8xbf16>, vector<8x4xbf16>, vector<8x4xf32> -> vector<8x4xf32>
    %128 = arith.truncf %113 : vector<8x8xf32> to vector<8x8xbf16>
    %c0_64 = arith.constant 0 : index
    %c4 = arith.constant 4 : index
    %c0_65 = arith.constant 0 : index
    %c0_66 = arith.constant 0 : index
    %129 = vector.load %arg7[%c0_64, %c4, %c0_65, %c0_66] : memref<1x8x8x8xbf16, #tpu.memory_space<vmem>>, vector<1x1x8x8xbf16>
    %130 = vector.shape_cast %129 : vector<1x1x8x8xbf16> to vector<8x8xbf16>
    %131 = vector.shape_cast %128 : vector<8x8xbf16> to vector<1x1x8x8xbf16>
    tpu.vector_store %arg7[%c0_64, %c4, %c0_65, %c0_66], %131 {strides = array<i32>} : memref<1x8x8x8xbf16, #tpu.memory_space<vmem>>, vector<1x1x8x8xbf16>,
    %132 = arith.truncf %125 : vector<8x8xf32> to vector<8x8xbf16>
    %c0_67 = arith.constant 0 : index
    %c4_68 = arith.constant 4 : index
    %c0_69 = arith.constant 0 : index
    %c0_70 = arith.constant 0 : index
    %133 = vector.load %arg6[%c0_67, %c4_68, %c0_69, %c0_70] : memref<1x8x8x8xbf16, #tpu.memory_space<vmem>>, vector<1x1x8x8xbf16>
    %134 = vector.shape_cast %133 : vector<1x1x8x8xbf16> to vector<8x8xbf16>
    %135 = vector.shape_cast %132 : vector<8x8xbf16> to vector<1x1x8x8xbf16>
    tpu.vector_store %arg6[%c0_67, %c4_68, %c0_69, %c0_70], %135 {strides = array<i32>} : memref<1x8x8x8xbf16, #tpu.memory_space<vmem>>, vector<1x1x8x8xbf16>,
    %136 = vector.extract_strided_slice %1 {offsets = [0, 20], sizes = [8, 4], strides = [1, 1]} : vector<8x32xbf16> to vector<8x4xbf16>
    %137 = vector.extract_strided_slice %3 {offsets = [0, 20], sizes = [8, 4], strides = [1, 1]} : vector<8x32xbf16> to vector<8x4xbf16>
    %138 = vector.extract_strided_slice %5 {offsets = [0, 20], sizes = [8, 4], strides = [1, 1]} : vector<8x32xbf16> to vector<8x4xbf16>
    %cst_71 = arith.constant dense<0.000000e+00> : vector<8x8xf32>
    %139 = tpu.matmul %136, %137, %cst_71 {dimension_numbers = #tpu.dot_dimension_numbers<[1], [1], [0], [0], [0, 0, 1, 0], [], []>} : vector<8x4xbf16>, vector<8x4xbf16>, vector<8x8xf32> -> vector<8x8xf32>
    %cst_72 = arith.constant dense<0xFF800000> : vector<8xf32>
    %140 = vector.multi_reduction <maximumf>, %139, %cst_72 [1] : vector<8x8xf32> to vector<8xf32>
    %141 = vector.shape_cast %140 : vector<8xf32> to vector<8x1xf32>
    %142 = vector.broadcast %141 : vector<8x1xf32> to vector<8x8xf32>
    %143 = arith.subf %139, %142 : vector<8x8xf32>
    %144 = math.exp %143 : vector<8x8xf32>
    %cst_73 = arith.constant dense<0.000000e+00> : vector<8xf32>
    %145 = vector.multi_reduction <add>, %144, %cst_73 [1] : vector<8x8xf32> to vector<8xf32>
    %146 = vector.shape_cast %145 : vector<8xf32> to vector<8x1xf32>
    %147 = tpu.reciprocal %146 {approx = true} : vector<8x1xf32> -> vector<8x1xf32>
    %cst_74 = arith.constant 0.176776692 : f32
    %148 = vector.broadcast %cst_74 : f32 to vector<8x1xf32>
    %149 = arith.mulf %147, %148 : vector<8x1xf32>
    %150 = vector.broadcast %149 : vector<8x1xf32> to vector<8x8xf32>
    %151 = arith.mulf %144, %150 : vector<8x8xf32>
    %152 = arith.truncf %151 : vector<8x8xf32> to vector<8x8xbf16>
    %cst_75 = arith.constant dense<0.000000e+00> : vector<8x4xf32>
    %153 = tpu.matmul %152, %138, %cst_75 {dimension_numbers = #tpu.dot_dimension_numbers<[1], [0], [0], [1], [0, 0, 1, 1], [], []>} : vector<8x8xbf16>, vector<8x4xbf16>, vector<8x4xf32> -> vector<8x4xf32>
    %154 = arith.truncf %139 : vector<8x8xf32> to vector<8x8xbf16>
    %c0_76 = arith.constant 0 : index
    %c5 = arith.constant 5 : index
    %c0_77 = arith.constant 0 : index
    %c0_78 = arith.constant 0 : index
    %155 = vector.load %arg7[%c0_76, %c5, %c0_77, %c0_78] : memref<1x8x8x8xbf16, #tpu.memory_space<vmem>>, vector<1x1x8x8xbf16>
    %156 = vector.shape_cast %155 : vector<1x1x8x8xbf16> to vector<8x8xbf16>
    %157 = vector.shape_cast %154 : vector<8x8xbf16> to vector<1x1x8x8xbf16>
    tpu.vector_store %arg7[%c0_76, %c5, %c0_77, %c0_78], %157 {strides = array<i32>} : memref<1x8x8x8xbf16, #tpu.memory_space<vmem>>, vector<1x1x8x8xbf16>,
    %158 = arith.truncf %151 : vector<8x8xf32> to vector<8x8xbf16>
    %c0_79 = arith.constant 0 : index
    %c5_80 = arith.constant 5 : index
    %c0_81 = arith.constant 0 : index
    %c0_82 = arith.constant 0 : index
    %159 = vector.load %arg6[%c0_79, %c5_80, %c0_81, %c0_82] : memref<1x8x8x8xbf16, #tpu.memory_space<vmem>>, vector<1x1x8x8xbf16>
    %160 = vector.shape_cast %159 : vector<1x1x8x8xbf16> to vector<8x8xbf16>
    %161 = vector.shape_cast %158 : vector<8x8xbf16> to vector<1x1x8x8xbf16>
    tpu.vector_store %arg6[%c0_79, %c5_80, %c0_81, %c0_82], %161 {strides = array<i32>} : memref<1x8x8x8xbf16, #tpu.memory_space<vmem>>, vector<1x1x8x8xbf16>,
    %162 = vector.extract_strided_slice %1 {offsets = [0, 24], sizes = [8, 4], strides = [1, 1]} : vector<8x32xbf16> to vector<8x4xbf16>
    %163 = vector.extract_strided_slice %3 {offsets = [0, 24], sizes = [8, 4], strides = [1, 1]} : vector<8x32xbf16> to vector<8x4xbf16>
    %164 = vector.extract_strided_slice %5 {offsets = [0, 24], sizes = [8, 4], strides = [1, 1]} : vector<8x32xbf16> to vector<8x4xbf16>
    %cst_83 = arith.constant dense<0.000000e+00> : vector<8x8xf32>
    %165 = tpu.matmul %162, %163, %cst_83 {dimension_numbers = #tpu.dot_dimension_numbers<[1], [1], [0], [0], [0, 0, 1, 0], [], []>} : vector<8x4xbf16>, vector<8x4xbf16>, vector<8x8xf32> -> vector<8x8xf32>
    %cst_84 = arith.constant dense<0xFF800000> : vector<8xf32>
    %166 = vector.multi_reduction <maximumf>, %165, %cst_84 [1] : vector<8x8xf32> to vector<8xf32>
    %167 = vector.shape_cast %166 : vector<8xf32> to vector<8x1xf32>
    %168 = vector.broadcast %167 : vector<8x1xf32> to vector<8x8xf32>
    %169 = arith.subf %165, %168 : vector<8x8xf32>
    %170 = math.exp %169 : vector<8x8xf32>
    %cst_85 = arith.constant dense<0.000000e+00> : vector<8xf32>
    %171 = vector.multi_reduction <add>, %170, %cst_85 [1] : vector<8x8xf32> to vector<8xf32>
    %172 = vector.shape_cast %171 : vector<8xf32> to vector<8x1xf32>
    %173 = tpu.reciprocal %172 {approx = true} : vector<8x1xf32> -> vector<8x1xf32>
    %cst_86 = arith.constant 0.176776692 : f32
    %174 = vector.broadcast %cst_86 : f32 to vector<8x1xf32>
    %175 = arith.mulf %173, %174 : vector<8x1xf32>
    %176 = vector.broadcast %175 : vector<8x1xf32> to vector<8x8xf32>
    %177 = arith.mulf %170, %176 : vector<8x8xf32>
    %178 = arith.truncf %177 : vector<8x8xf32> to vector<8x8xbf16>
    %cst_87 = arith.constant dense<0.000000e+00> : vector<8x4xf32>
    %179 = tpu.matmul %178, %164, %cst_87 {dimension_numbers = #tpu.dot_dimension_numbers<[1], [0], [0], [1], [0, 0, 1, 1], [], []>} : vector<8x8xbf16>, vector<8x4xbf16>, vector<8x4xf32> -> vector<8x4xf32>
    %180 = arith.truncf %165 : vector<8x8xf32> to vector<8x8xbf16>
    %c0_88 = arith.constant 0 : index
    %c6 = arith.constant 6 : index
    %c0_89 = arith.constant 0 : index
    %c0_90 = arith.constant 0 : index
    %181 = vector.load %arg7[%c0_88, %c6, %c0_89, %c0_90] : memref<1x8x8x8xbf16, #tpu.memory_space<vmem>>, vector<1x1x8x8xbf16>
    %182 = vector.shape_cast %181 : vector<1x1x8x8xbf16> to vector<8x8xbf16>
    %183 = vector.shape_cast %180 : vector<8x8xbf16> to vector<1x1x8x8xbf16>
    tpu.vector_store %arg7[%c0_88, %c6, %c0_89, %c0_90], %183 {strides = array<i32>} : memref<1x8x8x8xbf16, #tpu.memory_space<vmem>>, vector<1x1x8x8xbf16>,
    %184 = arith.truncf %177 : vector<8x8xf32> to vector<8x8xbf16>
    %c0_91 = arith.constant 0 : index
    %c6_92 = arith.constant 6 : index
    %c0_93 = arith.constant 0 : index
    %c0_94 = arith.constant 0 : index
    %185 = vector.load %arg6[%c0_91, %c6_92, %c0_93, %c0_94] : memref<1x8x8x8xbf16, #tpu.memory_space<vmem>>, vector<1x1x8x8xbf16>
    %186 = vector.shape_cast %185 : vector<1x1x8x8xbf16> to vector<8x8xbf16>
    %187 = vector.shape_cast %184 : vector<8x8xbf16> to vector<1x1x8x8xbf16>
    tpu.vector_store %arg6[%c0_91, %c6_92, %c0_93, %c0_94], %187 {strides = array<i32>} : memref<1x8x8x8xbf16, #tpu.memory_space<vmem>>, vector<1x1x8x8xbf16>,
    %188 = vector.extract_strided_slice %1 {offsets = [0, 28], sizes = [8, 4], strides = [1, 1]} : vector<8x32xbf16> to vector<8x4xbf16>
    %189 = vector.extract_strided_slice %3 {offsets = [0, 28], sizes = [8, 4], strides = [1, 1]} : vector<8x32xbf16> to vector<8x4xbf16>
    %190 = vector.extract_strided_slice %5 {offsets = [0, 28], sizes = [8, 4], strides = [1, 1]} : vector<8x32xbf16> to vector<8x4xbf16>
    %cst_95 = arith.constant dense<0.000000e+00> : vector<8x8xf32>
    %191 = tpu.matmul %188, %189, %cst_95 {dimension_numbers = #tpu.dot_dimension_numbers<[1], [1], [0], [0], [0, 0, 1, 0], [], []>} : vector<8x4xbf16>, vector<8x4xbf16>, vector<8x8xf32> -> vector<8x8xf32>
    %cst_96 = arith.constant dense<0xFF800000> : vector<8xf32>
    %192 = vector.multi_reduction <maximumf>, %191, %cst_96 [1] : vector<8x8xf32> to vector<8xf32>
    %193 = vector.shape_cast %192 : vector<8xf32> to vector<8x1xf32>
    %194 = vector.broadcast %193 : vector<8x1xf32> to vector<8x8xf32>
    %195 = arith.subf %191, %194 : vector<8x8xf32>
    %196 = math.exp %195 : vector<8x8xf32>
    %cst_97 = arith.constant dense<0.000000e+00> : vector<8xf32>
    %197 = vector.multi_reduction <add>, %196, %cst_97 [1] : vector<8x8xf32> to vector<8xf32>
    %198 = vector.shape_cast %197 : vector<8xf32> to vector<8x1xf32>
    %199 = tpu.reciprocal %198 {approx = true} : vector<8x1xf32> -> vector<8x1xf32>
    %cst_98 = arith.constant 0.176776692 : f32
    %200 = vector.broadcast %cst_98 : f32 to vector<8x1xf32>
    %201 = arith.mulf %199, %200 : vector<8x1xf32>
    %202 = vector.broadcast %201 : vector<8x1xf32> to vector<8x8xf32>
    %203 = arith.mulf %196, %202 : vector<8x8xf32>
    %204 = arith.truncf %203 : vector<8x8xf32> to vector<8x8xbf16>
    %cst_99 = arith.constant dense<0.000000e+00> : vector<8x4xf32>
    %205 = tpu.matmul %204, %190, %cst_99 {dimension_numbers = #tpu.dot_dimension_numbers<[1], [0], [0], [1], [0, 0, 1, 1], [], []>} : vector<8x8xbf16>, vector<8x4xbf16>, vector<8x4xf32> -> vector<8x4xf32>
    %206 = arith.truncf %191 : vector<8x8xf32> to vector<8x8xbf16>
    %c0_100 = arith.constant 0 : index
    %c7 = arith.constant 7 : index
    %c0_101 = arith.constant 0 : index
    %c0_102 = arith.constant 0 : index
    %207 = vector.load %arg7[%c0_100, %c7, %c0_101, %c0_102] : memref<1x8x8x8xbf16, #tpu.memory_space<vmem>>, vector<1x1x8x8xbf16>
    %208 = vector.shape_cast %207 : vector<1x1x8x8xbf16> to vector<8x8xbf16>
    %209 = vector.shape_cast %206 : vector<8x8xbf16> to vector<1x1x8x8xbf16>
    tpu.vector_store %arg7[%c0_100, %c7, %c0_101, %c0_102], %209 {strides = array<i32>} : memref<1x8x8x8xbf16, #tpu.memory_space<vmem>>, vector<1x1x8x8xbf16>,
    %210 = arith.truncf %203 : vector<8x8xf32> to vector<8x8xbf16>
    %c0_103 = arith.constant 0 : index
    %c7_104 = arith.constant 7 : index
    %c0_105 = arith.constant 0 : index
    %c0_106 = arith.constant 0 : index
    %211 = vector.load %arg6[%c0_103, %c7_104, %c0_105, %c0_106] : memref<1x8x8x8xbf16, #tpu.memory_space<vmem>>, vector<1x1x8x8xbf16>
    %212 = vector.shape_cast %211 : vector<1x1x8x8xbf16> to vector<8x8xbf16>
    %213 = vector.shape_cast %210 : vector<8x8xbf16> to vector<1x1x8x8xbf16>
    tpu.vector_store %arg6[%c0_103, %c7_104, %c0_105, %c0_106], %213 {strides = array<i32>} : memref<1x8x8x8xbf16, #tpu.memory_space<vmem>>, vector<1x1x8x8xbf16>,
    %214 = tpu.concatenate %23, %49, %75, %101, %127, %153, %179, %205 in 1 : vector<8x4xf32>, vector<8x4xf32>, vector<8x4xf32>, vector<8x4xf32>, vector<8x4xf32>, vector<8x4xf32>, vector<8x4xf32>, vector<8x4xf32> -> vector<8x32xf32>
    %215 = arith.truncf %214 : vector<8x32xf32> to vector<8x32xbf16>
    %c0_107 = arith.constant 0 : index
    %c0_108 = arith.constant 0 : index
    %c0_109 = arith.constant 0 : index
    %216 = vector.load %arg5[%c0_107, %c0_108, %c0_109] : memref<1x8x32xbf16, #tpu.memory_space<vmem>>, vector<1x8x32xbf16>
    %217 = vector.shape_cast %216 : vector<1x8x32xbf16> to vector<8x32xbf16>
    %218 = vector.shape_cast %215 : vector<8x32xbf16> to vector<1x8x32xbf16>
    tpu.vector_store %arg5[%c0_107, %c0_108, %c0_109], %218 {strides = array<i32>} : memref<1x8x32xbf16, #tpu.memory_space<vmem>>, vector<1x8x32xbf16>,
    return
  }
  func.func @transform_0(%arg0: i32, %arg1: i32) -> (i32, i32, i32, i32) {
    %c0_i32 = arith.constant 0 : i32
    %c0_i32_0 = arith.constant 0 : i32
    %c0_i32_1 = arith.constant 0 : i32
    return %c0_i32, %arg0, %arg1, %c0_i32_0 : i32, i32, i32, i32
  }
  func.func @transform_1(%arg0: i32, %arg1: i32) -> (i32, i32, i32, i32) {
    %c1_i32 = arith.constant 1 : i32
    %c0_i32 = arith.constant 0 : i32
    %c0_i32_0 = arith.constant 0 : i32
    %c0_i32_1 = arith.constant 0 : i32
    return %c1_i32, %arg0, %c0_i32, %c0_i32_0 : i32, i32, i32, i32
  }
  func.func @transform_2(%arg0: i32, %arg1: i32) -> (i32, i32, i32, i32) {
    %c2_i32 = arith.constant 2 : i32
    %c0_i32 = arith.constant 0 : i32
    %c0_i32_0 = arith.constant 0 : i32
    %c0_i32_1 = arith.constant 0 : i32
    return %c2_i32, %arg0, %c0_i32, %c0_i32_0 : i32, i32, i32, i32
  }
  func.func @transform_3(%arg0: i32, %arg1: i32) -> (i32, i32, i32) {
    %c0_i32 = arith.constant 0 : i32
    %c0_i32_0 = arith.constant 0 : i32
    return %arg0, %arg1, %c0_i32 : i32, i32, i32
  }
  func.func @transform_4(%arg0: i32, %arg1: i32) -> (i32, i32, i32, i32) {
    %c0_i32 = arith.constant 0 : i32
    %c0_i32_0 = arith.constant 0 : i32
    %c0_i32_1 = arith.constant 0 : i32
    return %arg0, %c0_i32, %arg1, %c0_i32_0 : i32, i32, i32, i32
  }
  func.func @transform_5(%arg0: i32, %arg1: i32) -> (i32, i32, i32, i32) {
    %c0_i32 = arith.constant 0 : i32
    %c0_i32_0 = arith.constant 0 : i32
    %c0_i32_1 = arith.constant 0 : i32
    return %arg0, %c0_i32, %arg1, %c0_i32_0 : i32, i32, i32, i32
  }
}

</mosaic_0001>

<bundles_post_ra>
// kernel: multi_head_attention.5
= control target key start
LH: loop header
LB: loop body
LE: loop exit
PB: predicated region body
PF: predicated region fallthrough
CT: control target
= control target key end

     0   :  { %8 = vsyncpa [#allocation3], 0  ;;  %s358_s0 = inlined_call_operand.hbm [shape: bf16[16,32], index: 0, kind: input, shape index: {}]   ;;  %s359_s1 = inlined_call_operand.hbm [shape: bf16[32,32], index: 1, kind: input, shape index: {}]   ;;  %s360_s2 = inlined_call_operand.hbm [shape: f32[1,32], index: 2, kind: input, shape index: {}]   ;;  %s361_s3 = inlined_call_operand.hbm [shape: f32[16,32], index: 3, kind: output, shape index: {}]  }
   0x1   :  { %9 = vsyncpa [#allocation6], 0 }
   0x2   :  { %10 = vsyncpa [#allocation4], 0  ;;  %s273_s12 = smov [#allocation5]   ;;  %s274_s14 = smov [#allocation2]  }
   0x3   :  { %s28_s13 = sshll.u32 %s273_s12, 4  ;;  %s16_s15 = sshll.u32 %s274_s14, 4  ;;  %s29_s13 = int_to_ptr.vmem [resolvable:$true] %s28_s13  ;;  %s303_s15 = int_to_ptr.vmem [resolvable:$true] %s16_s15 }
   0x4   :  { %s179_s18 = scalar_lea.hbm %s359_s1, 256 }
   0x5   :  { %p180_p0 = scmp.ne.s32.totalorder %s359_s1, %s179_s18  ;;  %p183_p1 = scmp.lt.u32.totalorder %s179_s18, %s359_s1 }
   0x7   :  { %p185_p2 = pnand %p183_p1, %p180_p0 }
   0x9   :  { %188 = shalt.err (!%p185_p2)
}
   0xa   :  { %s189_s23 = scalar_lea.vmem %s29_s13, 256  ;;  %p194_p4 = scmp.lt.s32.totalorder %s29_s13, %s29_s13 }
   0xb   :  { %p190_p3 = scmp.ne.s32.totalorder %s29_s13, %s189_s23  ;;  %p195_p5 = scmp.lt.s32.totalorder %s189_s23, %s189_s23 }
   0xd   :  { %p196_p6 = por %p195_p5, %p194_p4 }
   0xf   :  { %p197_p7 = pnand %p196_p6, %p190_p3 }
  0x11   :  { %200 = shalt.err (!%p197_p7)
}
  0x12   :  { %s275_s24 = smov 64   ;;  %s276_s25 = smov 4  }
  0x13   :  { %34 = dma.hbm_to_vmem [thread:$0]  %s359_s1, 256, %s29_s13, [#allocation6], %s275_s24, %s275_s24, %s276_s25  }
  0x14   :  { %s201_s30 = scalar_lea.hbm %s358_s0, 128 }
  0x15   :  { %p202_p8 = scmp.ne.s32.totalorder %s358_s0, %s201_s30  ;;  %p205_p9 = scmp.lt.u32.totalorder %s201_s30, %s358_s0 }
  0x17   :  { %p207_p10 = pnand %p205_p9, %p202_p8 }
  0x19   :  { %210 = shalt.err (!%p207_p10)
}
  0x1a   :  { %s211_s8 = scalar_lea.vmem %s303_s15, 128  ;;  %p216_p12 = scmp.lt.s32.totalorder %s303_s15, %s303_s15 }
  0x1b   :  { %p212_p11 = scmp.ne.s32.totalorder %s303_s15, %s211_s8  ;;  %p217_p13 = scmp.lt.s32.totalorder %s211_s8, %s211_s8 }
  0x1d   :  { %p218_p0 = por %p217_p13, %p216_p12 }
  0x1f   :  { %p219_p1 = pnand %p218_p0, %p212_p11 }
  0x21   :  { %222 = shalt.err (!%p219_p1)
}
  0x22   :  { %22 = dma.hbm_to_vmem [thread:$0]  %s358_s0, 128, %s303_s15, [#allocation3], %s275_s24, %s275_s24, %s276_s25  }
  0x23   :  { %s277_s10 = smov [#allocation7]   ;;  %s223_s14 = scalar_lea.hbm %s360_s2, 16 }
  0x24   :  { %s41_s11 = sshll.u32 %s277_s10, 4  ;;  %p224_p2 = scmp.ne.s32.totalorder %s360_s2, %s223_s14  ;;  %s42_s11 = int_to_ptr.vmem [resolvable:$true] %s41_s11 }
  0x25   :  { %p227_p3 = scmp.lt.u32.totalorder %s223_s14, %s360_s2 }
  0x27   :  { %p229_p4 = pnand %p227_p3, %p224_p2 }
  0x29   :  { %232 = shalt.err (!%p229_p4)
}
  0x2a   :  { %s233_s20 = scalar_lea.vmem %s42_s11, 16  ;;  %s237_s0 = scalar_lea.vmem %s42_s11, 32 }
  0x2b   :  { %p234_p5 = scmp.ne.s32.totalorder %s42_s11, %s233_s20  ;;  %p238_p6 = scmp.lt.s32.totalorder %s42_s11, %s42_s11 }
  0x2c   :  { %p239_p7 = scmp.lt.s32.totalorder %s237_s0, %s233_s20 }
  0x2e   :  { %p240_p8 = por %p239_p7, %p238_p6 }
  0x30   :  { %p241_p9 = pnand %p240_p8, %p234_p5 }
  0x32   :  { %244 = shalt.err (!%p241_p9)
}
  0x33   :  { %44 = dma.hbm_to_vmem [thread:$0]  %s360_s2, 16, %s42_s11, [#allocation6]  }
  0x34   :  { %267 = dma.done.wait [#allocation3], 128  }
  0x35   :  { %268 = vsyncadd [#allocation3], 4294967168 }
  0x36   :  { %269 = dma.done.wait [#allocation6], 272  }
  0x37   :  { %270 = vsyncadd [#allocation6], 4294967024  ;;  %v278_v0 = vmov 0.0   ;;  %vm279_vm0 = vmmov 0   ;;  %v176_v1 = vld [vmem:[#allocation5] sm:$0xff]   ;;  %v177_v2 = vld [vmem:[#allocation5 + $0x8] sm:$0xff]  }
  0x38   :  { %158 = vmatprep.subr.bf16.mxu0 %v278_v0  ;;  %162 = vmatprep.mubr.msk.bf16.mxu0 %vm279_vm0, %v278_v0  ;;  %v178_v3 = vld [vmem:[#allocation2] sm:$0xff]   ;;  %vm85_vm1 = vcmask 261120   ;;  %v150_v4 = vld [vmem:[#allocation7] ss:$0 sm:$0xff]  ;;  %s280_s22 = smov [#allocation8]  }
  0x39   :  { %159 = vmatpush3.bf16.msra.mxu0 %v176_v1  ;;  %s137_s23 = sshll.u32 %s280_s22, 4  ;;  %s138_s23 = int_to_ptr.vmem [resolvable:$true] %s137_s23 }
  0x3a   :  { %160 = vmatprep.subr.bf16.mxu0 %v278_v0  ;;  %s245_s2 = scalar_lea.vmem %s138_s23, 256  ;;  %p250_p11 = scmp.lt.s32.totalorder %s138_s23, %s138_s23 }
  0x3b   :  { %p246_p10 = scmp.ne.s32.totalorder %s138_s23, %s245_s2  ;;  %p251_p12 = scmp.lt.s32.totalorder %s245_s2, %s245_s2 }
  0x3d   :  { %161 = vmatpush3.bf16.msra.mxu0 %v177_v2  ;;  %p252_p13 = por %p251_p12, %p250_p11 }
  0x3f   :  { %p253_p0 = pnand %p252_p13, %p246_p10 }
  0x40   :  { %163 = vmatmul.mubr.msk.bf16.vlgmr.msra.gmra.mrb[0].mxu0 %vm85_vm1, %v178_v3 }
 0x113   :  { %v123_v5 = vpop.f32.mrb[0].mxu0 }
 0x114   :  { %v124_v6 = vadd.f32 %v150_v4, %v123_v5  ;;  %v164_v7 = vpop.f32.mrb[1].mxu0 }
 0x115   :  { %v126_v8 = vpop.f32.mrb[2].mxu0 }
 0x116   :  { %130 = vst.msk [vmem:[#allocation8] sm:$0xff] %vm85_vm1, %v124_v6  ;;  %v127_v9 = vadd.f32 %v150_v4, %v126_v8  ;;  %v165_v10 = vpop.f32.mrb[3].mxu0 }
 0x118   :  { %131 = vst.msk [vmem:[#allocation8 + $0x8] sm:$0xff] %vm85_vm1, %v127_v9 }
 0x119   :  { %256 = shalt.err (!%p253_p0)
}
 0x11a   :  { %s257_s26 = scalar_lea.hbm %s361_s3, 256 }
 0x11b   :  { %p258_p1 = scmp.ne.s32.totalorder %s361_s3, %s257_s26  ;;  %p261_p2 = scmp.lt.u32.totalorder %s257_s26, %s361_s3 }
 0x11d   :  { %p263_p3 = pnand %p261_p2, %p258_p1 }
 0x11f   :  { %266 = shalt.err (!%p263_p3)
}
 0x120   :  { %s281_s4 = smov 128   ;;  %s282_s5 = smov 8  }
 0x121   :  { %143 = dma.vmem_to_hbm [thread:$0]  %s138_s23, 256, %s361_s3, [#allocation4], %s281_s4, %s281_s4, %s282_s5  }
 0x122   :  { %271 = dma.done.wait [#allocation4], 256  }
 0x123   :  { %272 = vsyncadd [#allocation4], 4294967040 }
 0x124   :  { %147 = vsyncpa [#allocation3], 1 }
 0x125   :  { %148 = vsyncpa [#allocation6], 1 }
 0x126   :  { %149 = vsyncpa [#allocation4], 1 }

// kernel: multi_head_attention.3
= control target key start
LH: loop header
LB: loop body
LE: loop exit
PB: predicated region body
PF: predicated region fallthrough
CT: control target
= control target key end

     0   :  { %s1065_s0 = inlined_call_operand.hbm [shape: f32[16,32], index: 0, kind: input, shape index: {}]   ;;  %s1066_s1 = inlined_call_operand.hbm [shape: bf16[3,32,32], index: 1, kind: input, shape index: {}]   ;;  %s1067_s2 = inlined_call_operand.hbm [shape: f32[3,1,32], index: 2, kind: input, shape index: {}]   ;;  %s1068_s3 = inlined_call_operand.hbm [shape: bf16[3,16,32], index: 3, kind: output, shape index: {}]  }
   0x1   :  { %1077 = sst [smem:[#allocation13_spill]] %s1066_s1 }
   0x2   :  { %8 = vsyncpa [#allocation3], 0 }
   0x3   :  { %9 = vsyncpa [#allocation6], 0 }
   0x4   :  { %11 = vsyncpa [#allocation6 + $0x1], 0 }
   0x5   :  { %12 = vsyncpa [#allocation4], 0 }
   0x6   :  { %14 = vsyncpa [#allocation4 + $0x1], 0  ;;  %s808_s12 = smov 0   ;;  %s810_s13 = smov 0  }
   0x7   :  { %s812_s14 = smov 0   ;;  %s814_s15 = smov 0  }
   0x8   :  { %s816_s16 = smov 0   ;;  %s818_s17 = smov 0  }
   0x9 LB: > { %s32_s18 = sadd.s32 1, %s770_s16  ;;  %s65_s19 = sadd.s32 1, %s762_s14  ;;  %s774_s17 = sphi %s818_s17, %s20_s17   ;;  %s770_s16 = sphi %s816_s16, %s1100_s16   ;;  %s766_s15 = sphi %s814_s15, %s1099_s15   ;;  %s762_s14 = sphi %s812_s14, %s1098_s14   ;;  %s758_s13 = sphi %s810_s13, %s1097_s13   ;;  %s754_s12 = sphi %s808_s12, %s1096_s12  }
   0xa   : > { %p34_p0 = scmp.ge.s32.totalorder %s32_s18, 3  ;;  %p72_p1 = scmp.ne.s32.totalorder %s762_s14, %s758_s13 }
   0xb   : > { %p73_p2 = scmp.eq.s32.totalorder %s774_s17, 0  ;;  %p538_p4 = scmp.lt.s32.totalorder %s774_s17, 3 }
   0xc   : > { %s1102_s18 = smov (%p34_p0, %s32_s18), 0  ;;  %s172_s21 = sand.u32 1, %s774_s17  }
   0xd   : > { %1078 = sst [smem:[#allocation12_spill]] %s1102_s18  ;;  %p74_p3 = por %p73_p2, %p72_p1 }
   0xe   : > { %s62_s20 = ssub.s32 %s770_s16, %s1102_s18  ;;  %s174_s22 = sand.u32 1, %s762_s14  }
   0xf   : > { %p63_p5 = scmp.eq.s32.totalorder %s62_s20, 0  ;;  %s497_s23 = sshll.u32 %s770_s16, 8 }
  0x10   : > { %s478_s25 = sshll.u32 %s174_s22, 4  ;;  %s1079_s1 = sld [smem:[#allocation13_spill]] }
  0x11   : > { %s855_s24 = scalar_select %p63_p5, %s762_s14, %s65_s19  }
  0x12   : > { %p864_p6 = pnand %p538_p4, %p74_p3  ;;  %s176_s30 = scalar_lea.vmem [#allocation5], %s478_s25 }
  0x13   : > { %s183_s4 = sshll.u32 %s176_s30, 4  ;;  %s870_s5 = scalar_lea.sflag [#allocation6], %s172_s21  ;;  %s868_s4 = int_to_ptr.vmem [resolvable:$true] %s183_s4 }
  0x14   : > { %s1080_s29 = scalar_select %p864_p6, 1, 0 }
  0x15   : > { %p1071_p8 = pneg %p864_p6 }
  0x16   : > { %s862_s28 = scalar_lea.hbm %s1079_s1, %s497_s23  ;;  %s605_s9 = scalar_lea.hbm %s1079_s1, 768 }
  0x17   : > { %s600_s6 = scalar_lea.hbm %s862_s28, 256  ;;  %p606_p11 = scmp.lt.u32.totalorder %s862_s28, %s1079_s1 }
  0x18   : > { %p601_p7 = scmp.ne.s32.totalorder %s862_s28, %s600_s6  ;;  %p607_p12 = scmp.lt.u32.totalorder %s605_s9, %s600_s6 }
  0x19   : > { %p609_p0 = scmp.lt.u32.totalorder %s600_s6, %s862_s28 }
  0x1a   : > { %p603_p9 = pnand %p1071_p8, %p601_p7  ;;  %p608_p13 = por %p607_p12, %p606_p11 }
  0x1c   : > { %p604_p10 = pneg %p603_p9  ;;  %p610_p2 = por %p609_p0, %p608_p13 }
  0x1e   : > { %p611_p3 = pnand %p610_p2, %p604_p10 }
  0x20   : > { %614 = shalt.err (!%p611_p3)
}
  0x21   : > { %s615_s19 = scalar_lea.vmem %s868_s4, 256  ;;  %s776_s20 = smov [#allocation5]  }
  0x22   : > { %p616_p4 = scmp.ne.s32.totalorder %s868_s4, %s615_s19  ;;  %s620_s21 = sshll.u32 %s776_s20, 4  ;;  %s621_s21 = int_to_ptr.vmem [resolvable:$false] %s620_s21 }
  0x23   : > { %s622_s23 = scalar_lea.vmem %s621_s21, 512  ;;  %p623_p9 = scmp.lt.s32.totalorder %s868_s4, %s621_s21 }
  0x24   : > { %p618_p5 = pnand %p616_p4, %p1071_p8  ;;  %p624_p11 = scmp.lt.s32.totalorder %s622_s23, %s615_s19 }
  0x26   : > { %p619_p7 = pneg %p618_p5  ;;  %p625_p12 = por %p624_p11, %p623_p9 }
  0x28   : > { %p626_p13 = pnand %p625_p12, %p619_p7 }
  0x2a   : > { %629 = shalt.err (!%p626_p13)
}
  0x2b   : > { %s777_s25 = smov 64   ;;  %s778_s26 = smov 4  }
  0x2c   : > { %529 = dma.hbm_to_vmem [thread:$0]  (!%p864_p6), %s862_s28, 256, %s868_s4, %s870_s5, %s777_s25, %s777_s25, %s778_s26  }
  0x2d   : > { %s899_s27 = sadd.s32 4294967295, %s774_s17   ;;  %s474_s30 = sadd.s32 4294967294, %s774_s17  }
  0x2e   : > { %p78_p10 = scmp.ne.s32.totalorder %s758_s13, %s754_s12  ;;  %p1070_p0 = scmp.eq.s32.totalorder %s899_s27, 0 }
  0x2f   : > { %p130_p2 = scmp.eq.s32.totalorder %s899_s27, 2  ;;  %p136_p3 = scmp.eq.s32.totalorder %s474_s30, 2 }
  0x30   : > { %p475_p4 = scmp.ge.s32.totalorder %s774_s17, 1  ;;  %p909_p5 = por %p1070_p0, %p78_p10 }
  0x31   : > { %p916_p7 = por %p130_p2, %p72_p1  ;;  %p920_p9 = por %p136_p3, %p78_p10 }
  0x32   : > { %s1081_s6 = scalar_select %p909_p5, 1, 0 }
  0x33   : > { %s1082_s28 = scalar_select %p916_p7, 1, 0 }
  0x34   : > { %s1083_s4 = scalar_select %p920_p9, 1, 0 }
  0x35   : > { %p143_p11 = scmp.lt.s32.totalorder %s774_s17, 4  ;;  %s779_s8 = smov [#allocation2]  }
  0x36   : > { %s158_s9 = sshll.u32 %s779_s8, 4  ;;  %s481_s10 = sshll.u32 %s770_s16, 4  ;;  %s929_s9 = int_to_ptr.vmem [resolvable:$true] %s158_s9 }
  0x37   : > { %p925_p12 = pnand %p475_p4, %p143_p11  ;;  %s943_s21 = scalar_lea.hbm %s1067_s2, %s481_s10 }
  0x38   : > { %s196_s23 = scalar_lea.vmem [#allocation7], %s174_s22  ;;  %s630_s8 = scalar_lea.hbm %s1065_s0, 256 }
  0x39   : > { %s1084_s7 = scalar_select %p925_p12, 1, 0 }
  0x3a   : > { %p522_p13 = pneg %p925_p12  ;;  %s203_s25 = sshll.u32 %s196_s23, 4  ;;  %s947_s25 = int_to_ptr.vmem [resolvable:$true] %s203_s25 }
  0x3b   : > { %p631_p10 = scmp.ne.s32.totalorder %s1065_s0, %s630_s8  ;;  %p637_p11 = scmp.lt.u32.totalorder %s630_s8, %s1065_s0 }
  0x3c   : > { %p936_p1 = pnand %p522_p13, %p1070_p0 }
  0x3e   : > { %p632_p2 = pneg %p936_p1 }
  0x40   : > { %p633_p3 = pnand %p632_p2, %p631_p10 }
  0x42   : > { %p634_p4 = pneg %p633_p3 }
  0x44   : > { %p639_p13 = pnand %p637_p11, %p634_p4 }
  0x46   : > { %642 = shalt.err (!%p639_p13)
}
  0x47   : > { %s643_s22 = scalar_lea.vmem %s929_s9, 256  ;;  %p651_p7 = scmp.lt.s32.totalorder %s929_s9, %s929_s9 }
  0x48   : > { %p644_p0 = scmp.ne.s32.totalorder %s929_s9, %s643_s22  ;;  %p652_p5 = scmp.lt.s32.totalorder %s643_s22, %s643_s22 }
  0x4a   : > { %p646_p8 = pnand %p644_p0, %p632_p2  ;;  %p653_p12 = por %p652_p5, %p651_p7 }
  0x4c   : > { %p647_p9 = pneg %p646_p8 }
  0x4e   : > { %p654_p6 = pnand %p653_p12, %p647_p9 }
  0x50   : > { %657 = shalt.err (!%p654_p6)
}
  0x51   : > { %s780_s1 = smov 128   ;;  %s781_s18 = smov 8  }
  0x52   : > { %525 = dma.hbm_to_vmem [thread:$0]  (!%p936_p1), %s1065_s0, 256, %s929_s9, [#allocation3], %s780_s1, %s780_s1, %s781_s18  }
  0x53   : > { %s658_s26 = scalar_lea.hbm %s943_s21, 16  ;;  %p1086_p0 = scmp.ne.s32.totalorder %s1080_s29, 0 }
  0x54   : > { %p659_p8 = scmp.ne.s32.totalorder %s943_s21, %s658_s26  ;;  %s663_s19 = scalar_lea.hbm %s1067_s2, 48 }
  0x55   : > { %p1087_p5 = pneg %p1086_p0  ;;  %p664_p9 = scmp.lt.u32.totalorder %s943_s21, %s1067_s2 }
  0x56   : > { %p665_p12 = scmp.lt.u32.totalorder %s663_s19, %s658_s26  ;;  %p667_p2 = scmp.lt.u32.totalorder %s658_s26, %s943_s21 }
  0x57   : > { %p661_p7 = pnand %p659_p8, %p1087_p5 }
  0x58   : > { %p666_p10 = por %p665_p12, %p664_p9 }
  0x59   : > { %p662_p6 = pneg %p661_p7 }
  0x5a   : > { %p668_p3 = por %p667_p2, %p666_p10 }
  0x5c   : > { %p669_p4 = pnand %p668_p3, %p662_p6 }
  0x5e   : > { %672 = shalt.err (!%p669_p4)
}
  0x5f   : > { %s673_s9 = scalar_lea.vmem %s947_s25, 16  ;;  %p1088_p11 = pmov %p1087_p5 }
  0x60   : > { %p674_p1 = scmp.ne.s32.totalorder %s947_s25, %s673_s9  ;;  %s782_s11 = smov [#allocation7]  }
  0x61   : > { %s678_s1 = sshll.u32 %s782_s11, 4  ;;  %s679_s1 = int_to_ptr.vmem [resolvable:$false] %s678_s1 }
  0x62   : > { %p676_p13 = pnand %p674_p1, %p1088_p11  ;;  %s680_s18 = scalar_lea.vmem %s679_s1, 32 }
  0x63   : > { %p681_p5 = scmp.lt.s32.totalorder %s947_s25, %s679_s1  ;;  %p682_p7 = scmp.lt.s32.totalorder %s680_s18, %s673_s9 }
  0x64   : > { %p677_p8 = pneg %p676_p13 }
  0x65   : > { %p683_p9 = por %p682_p7, %p681_p5 }
  0x67   : > { %p684_p12 = pnand %p683_p9, %p677_p8 }
  0x69   : > { %687 = shalt.err (!%p684_p12)
}
  0x6a   : > { %532 = dma.hbm_to_vmem [thread:$0]  (!%p1086_p0), %s943_s21, 16, %s947_s25, %s870_s5  }
  0x6b   : > { %p1089_p6 = scmp.ne.s32.totalorder %s1084_s7, 0 }
  0x6c   : > { %p1090_p10 = scmp.eq.s32.totalorder (!%p1089_p6), %s899_s27, 0 }
  0x6d   : > { %212 = sbr.rel (%p1089_p6) target bundleno = 364 (0x16c), region = 32 }
  0x74   : > { %741 = dma.done.wait (%p1090_p10), [#allocation3], 256   ;;  %p1091_p2 = pmov %p1090_p10 }
  0x75   : > { %s218_s20 = sand.u32 1, %s899_s27   ;;  %s1002_s23 = sand.u32 1, %s758_s13  }
  0x76   : > { %743 = vsyncadd (%p1091_p2), [#allocation3], 4294967040  ;;  %s484_s29 = sshll.u32 %s1002_s23, 4  ;;  %s219_s26 = scalar_lea.sflag [#allocation6], %s218_s20 }
  0x77   : > { %s222_s30 = scalar_lea.vmem [#allocation5], %s484_s29  ;;  %p1092_p0 = scmp.ne.s32.totalorder %s1081_s6, 0 }
  0x79   : > { %745 = dma.done.wait (%p1092_p0), %s219_s26, 272  }
  0x7a   : > { %747 = vsyncadd (%p1092_p0), %s219_s26, 4294967024  ;;  %v783_v0 = vmov 0.0   ;;  %vm784_vm0 = vmmov 0   ;;  %v598_v1 = vld [vmem:[%s222_s30] sm:$0xff]   ;;  %v599_v2 = vld [vmem:[%s222_s30 + $0x8] sm:$0xff]   ;;  %vm286_vm1 = vcmask 261120  }
  0x7b   : > { %504 = vmatprep.subr.bf16.mxu0 %v783_v0  ;;  %508 = vmatprep.mubr.msk.bf16.mxu0 %vm784_vm0, %v783_v0  ;;  %v260_v3 = vld [vmem:[#allocation2] sm:$0xff]  ;;  %v261_v4 = vld [vmem:[#allocation2 + $0x8] sm:$0xff]  ;;  %s485_s5 = sshll.u32 %s1002_s23, 3  ;;  %s230_s27 = scalar_lea.vmem [#allocation7], %s1002_s23  ;;  %vm339_vm2 = vcmask 257024  }
  0x7c   : > { %505 = vmatpush3.bf16.msra.mxu0 %v598_v1  ;;  %v262_v5 = vpack.c.bf16 %v261_v4, %v260_v3  ;;  %v486_v6 = vld [vmem:[%s230_s27] ss:$0 sm:$0xff]  ;;  %s256_s6 = scalar_lea.vmem [#allocation8], %s485_s5  ;;  %s500_s21 = sshll.u32 %s766_s15, 7 }
  0x7d   : > { %506 = vmatprep.subr.bf16.mxu0 %v783_v0  ;;  %s358_s7 = sshll.u32 %s256_s6, 4  ;;  %s1015_s19 = scalar_lea.hbm %s1068_s3, %s500_s21  ;;  %s1017_s7 = int_to_ptr.vmem [resolvable:$true] %s358_s7 }
  0x7e   : > { %s343_s10 = scalar_lea.sflag [#allocation4], %s1002_s23  ;;  %s688_s15 = scalar_lea.vmem %s1017_s7, 128 }
  0x7f   : > { %p689_p3 = scmp.ne.s32.totalorder %s1017_s7, %s688_s15  ;;  %p1093_p4 = scmp.ne.s32.totalorder %s1082_s28, 0 }
  0x80   : > { %507 = vmatpush3.bf16.msra.mxu0 %v599_v2  ;;  %s785_s22 = smov [#allocation8]  }
  0x81   : > { %p690_p1 = pnand %p689_p3, %p1093_p4  ;;  %s692_s9 = sshll.u32 %s785_s22, 4  ;;  %s693_s9 = int_to_ptr.vmem [resolvable:$false] %s692_s9 }
  0x82   : > { %s694_s11 = scalar_lea.vmem %s693_s9, 256  ;;  %p695_p13 = scmp.lt.s32.totalorder %s1017_s7, %s693_s9 }
  0x83   : > { %509 = vmatmul.mubr.msk.bf16.vlgmr.msra.gmra.mrb[0].mxu0 %vm286_vm1, %v262_v5  ;;  %p691_p11 = pneg %p690_p1  ;;  %p696_p8 = scmp.lt.s32.totalorder %s694_s11, %s688_s15 }
  0x85   : > { %p697_p5 = por %p696_p8, %p695_p13 }
  0x87   : > { %p698_p7 = pnand %p697_p5, %p691_p11 }
 0x156   : > { %v324_v7 = vpop.f32.mrb[0].mxu0 }
 0x157   : > { %v325_v8 = vadd.f32 %v486_v6, %v324_v7  ;;  %v510_v9 = vpop.f32.mrb[1].mxu0 }
 0x158   : > { %v327_v10 = vpop.f32.mrb[2].mxu0 }
 0x159   : > { %v498_v11 = vpack.c.bf16 %v325_v8, %v325_v8  ;;  %v328_v12 = vadd.f32 %v486_v6, %v327_v10  ;;  %v511_v13 = vpop.f32.mrb[3].mxu0 }
 0x15b   : > { %340 = vst.msk [vmem:[%s256_s6] sm:$0xf] %vm339_vm2, %v498_v11  ;;  %v499_v14 = vpack.c.bf16 %v328_v12, %v328_v12 }
 0x15d   : > { %341 = vst.msk [vmem:[%s256_s6 + $0x4] sm:$0xf] %vm339_vm2, %v499_v14 }
 0x15e   : > { %701 = shalt.err (!%p698_p7)
}
 0x15f   : > { %s702_s1 = scalar_lea.hbm %s1015_s19, 128  ;;  %s706_s29 = scalar_lea.hbm %s1068_s3, 384 }
 0x160   : > { %p703_p9 = scmp.ne.s32.totalorder %s1015_s19, %s702_s1  ;;  %p707_p10 = scmp.lt.u32.totalorder %s1015_s19, %s1068_s3 }
 0x161   : > { %p708_p2 = scmp.lt.u32.totalorder %s706_s29, %s702_s1  ;;  %p710_p3 = scmp.lt.u32.totalorder %s702_s1, %s1015_s19 }
 0x162   : > { %p704_p12 = pnand %p703_p9, %p1093_p4 }
 0x163   : > { %p709_p0 = por %p708_p2, %p707_p10 }
 0x164   : > { %p705_p6 = pneg %p704_p12 }
 0x165   : > { %p711_p1 = por %p710_p3, %p709_p0 }
 0x167   : > { %p712_p11 = pnand %p711_p1, %p705_p6 }
 0x169   : > { %715 = shalt.err (!%p712_p11)
}
 0x16a   : > { %s786_s5 = smov 64   ;;  %s787_s27 = smov 4  }
 0x16b   : > { %520 = dma.vmem_to_hbm [thread:$0]  (%p1093_p4), %s1017_s7, 128, %s1015_s19, %s343_s10, %s786_s5, %s786_s5, %s787_s27  }
 0x16c PF: > { %p540_p13 = scmp.ge.s32.totalorder %s774_s17, 2  ;;  %s373_s6 = sand.u32 1, %s754_s12  }
 0x16d   : > { %p1094_p8 = scmp.ne.s32.totalorder %s1083_s4, 0  ;;  %s374_s21 = scalar_lea.sflag [#allocation4], %s373_s6 }
 0x16f   : > { %p534_p5 = pnand %p540_p13, %p1094_p8 }
 0x171   : > { %749 = dma.done.wait (!%p534_p5), %s374_s21, 128  }
 0x172   : > { %751 = vsyncadd (!%p534_p5), %s374_s21, 4294967168  ;;  %s20_s17 = sadd.s32 1, %s774_s17   ;;  %s1095_s28 = sld [smem:[#allocation12_spill]] }
 0x173   : > { %p17_p7 = scmp.ge.s32.totalorder %s20_s17, 5   ;;  %s1096_s12 = smov %s758_s13 }
 0x174   : > { %s1097_s13 = smov %s762_s14  ;;  %s1098_s14 = smov %s855_s24 }
 0x175   : > { %s1099_s15 = smov %s770_s16  ;;  %19 = sbr.rel (!%p17_p7) target bundleno = 9 (0x9), region = 94 }
 0x178   : > { %s1100_s16 = smov %s1095_s28 }
 0x17c   :  { %379 = vsyncpa [#allocation3], 1 }
 0x17d   :  { %381 = vsyncpa [#allocation3 + $0x1], 1 }
 0x17e   :  { %382 = vsyncpa [#allocation6], 1 }
 0x17f   :  { %384 = vsyncpa [#allocation6 + $0x1], 1 }
 0x180   :  { %385 = vsyncpa [#allocation4], 1 }
 0x181   :  { %387 = vsyncpa [#allocation4 + $0x1], 1 }

// kernel: multi_head_attention.4
= control target key start
LH: loop header
LB: loop body
LE: loop exit
PB: predicated region body
PF: predicated region fallthrough
CT: control target
= control target key end

     0   :  { %s2730_s0 = inlined_call_operand.hbm [shape: bf16[3,2,8,32], index: 0, kind: input, shape index: {}, may-alias: {0,1,2}]   ;;  %s2731_s1 = inlined_call_operand.hbm [shape: bf16[3,2,8,32], index: 1, kind: input, shape index: {}, may-alias: {0,1,2}]   ;;  %s2732_s2 = inlined_call_operand.hbm [shape: bf16[3,2,8,32], index: 2, kind: input, shape index: {}, may-alias: {0,1,2}]   ;;  %s2733_s3 = inlined_call_operand.hbm [shape: bf16[2,8,32], index: 3, kind: output, shape index: {0}]   ;;  %s2734_s4 = inlined_call_operand.hbm [shape: bf16[2,8,8,8], index: 4, kind: output, shape index: {1}]   ;;  %s2735_s5 = inlined_call_operand.hbm [shape: bf16[2,8,8,8], index: 5, kind: output, shape index: {2}]  }
   0x1   :  { %2748 = sst [smem:[#allocation22_spill]] %s2730_s0 }
   0x2   :  { %2749 = sst [smem:[#allocation23_spill]] %s2731_s1 }
   0x3   :  { %11 = vsyncpa [#allocation3], 0 }
   0x4   :  { %13 = vsyncpa [#allocation3 + $0x1], 0 }
   0x5   :  { %14 = vsyncpa [#allocation6], 0 }
   0x6   :  { %16 = vsyncpa [#allocation6 + $0x1], 0 }
   0x7   :  { %17 = vsyncpa [#allocation4], 0 }
   0x8   :  { %19 = vsyncpa [#allocation4 + $0x1], 0 }
   0x9   :  { %20 = vsyncpa [#allocation10], 0 }
   0xa   :  { %22 = vsyncpa [#allocation10 + $0x1], 0  ;;  %s2198_s18 = smov 0   ;;  %s2200_s19 = smov 0  }
   0xb   :  { %s2202_s20 = smov 0   ;;  %s2204_s21 = smov 0  }
   0xc   :  { %s2206_s22 = smov 0   ;;  %s2208_s23 = smov 0  }
   0xd LB: > { %2750 = sst [smem:[#allocation16_spill]] %s2131_s20  ;;  %s2229_s24 = sadd.s32 4294967295, %s2143_s23   ;;  %s2143_s23 = sphi %s2208_s23, %s28_s23   ;;  %s2139_s22 = sphi %s2206_s22, %s2780_s22   ;;  %s2135_s21 = sphi %s2204_s21, %s2779_s21   ;;  %s2131_s20 = sphi %s2202_s20, %s2778_s20   ;;  %s2127_s19 = sphi %s2200_s19, %s2782_s19   ;;  %s2123_s18 = sphi %s2198_s18, %s2781_s18  }
   0xe   : > { %2751 = sst [smem:[#allocation17_spill]] %s2139_s22  ;;  %s2736_s25 = sadd.s32 4294967294, %s2143_s23  }
   0xf   : > { %2752 = sst [smem:[#allocation18_spill]] %s2143_s23  ;;  %s40_s26 = sadd.s32 1, %s2139_s22 }
  0x10   : > { %s49_s27 = sadd.s32 1, %s2131_s20  ;;  %p42_p0 = scmp.ge.s32.totalorder %s40_s26, 2 }
  0x11   : > { %p56_p1 = scmp.ne.s32.totalorder %s2131_s20, %s2127_s19  ;;  %p57_p2 = scmp.eq.s32.totalorder %s2143_s23, 0 }
  0x12   : > { %p62_p3 = scmp.ne.s32.totalorder %s2127_s19, %s2123_s18  ;;  %s2784_s26 = smov (%p42_p0, %s40_s26), 0 }
  0x13   : > { %2753 = sst [smem:[#allocation19_spill]] %s2784_s26  ;;  %p2241_p4 = por %p57_p2, %p56_p1 }
  0x14   : > { %p63_p5 = scmp.eq.s32.totalorder %s2229_s24, 0  ;;  %s44_s29 = ssub.s32 %s2139_s22, %s2784_s26 }
  0x15   : > { %p140_p6 = scmp.eq.s32.totalorder %s2229_s24, 1  ;;  %p47_p7 = scmp.eq.s32.totalorder %s44_s29, 0 }
  0x16   : > { %p2249_p8 = por %p63_p5, %p62_p3  ;;  %p146_p10 = scmp.eq.s32.totalorder %s2736_s25, 1 }
  0x17   : > { %p2253_p9 = por %p140_p6, %p56_p1  ;;  %p1803_p13 = scmp.lt.s32.totalorder %s2143_s23, 2 }
  0x18   : > { %s2755_s30 = scalar_select %p2249_p8, 1, 0 }
  0x19   : > { %s2756_s6 = scalar_select %p2253_p9, 1, 0 }
  0x1a   : > { %s2260_s7 = scalar_select %p47_p7, %s2131_s20, %s49_s27  }
  0x1b   : > { %p2262_p11 = por %p146_p10, %p62_p3  ;;  %s2737_s9 = sand.u32 1, %s2131_s20  }
  0x1c   : > { %2757 = sst [smem:[#allocation20_spill]] %s2260_s7  ;;  %s2271_s10 = sshll.u32 %s2737_s9, 2 }
  0x1d   : > { %s2758_s8 = scalar_select %p2262_p11, 1, 0 }
  0x1e   : > { %s2274_s11 = sshll.u32 %s2139_s22, 6  ;;  %p2278_p0 = pnand %p1803_p13, %p2241_p4 }
  0x1f   : > { %2759 = sst [smem:[#allocation21_spill]] %s2758_s8  ;;  %s241_s13 = sand.u32 1, %s2143_s23  }
  0x20   : > { %s2760_s12 = scalar_select %p2278_p0, 1, 0 }
  0x21   : > { %s2761_s1 = sld [smem:[#allocation23_spill]]  ;;  %s245_s27 = scalar_lea.vmem [#allocation5], %s2271_s10 }
  0x22   : > { %s253_s29 = sshll.u32 %s245_s27, 4  ;;  %s2293_s28 = scalar_lea.sflag [#allocation6], %s241_s13  ;;  %s2290_s29 = int_to_ptr.vmem [resolvable:$true] %s253_s29 }
  0x23   : > { %p2298_p3 = pneg %p2278_p0 }
  0x27   : > { %s1449_s16 = scalar_lea.hbm %s2761_s1, %s2274_s11  ;;  %s1910_s27 = scalar_lea.hbm %s2761_s1, 384 }
  0x28   : > { %s2287_s17 = scalar_lea.hbm %s1449_s16, 128  ;;  %s1935_s25 = scalar_lea.hbm %s1449_s16, 192 }
  0x29   : > { %p1906_p2 = scmp.ne.s32.totalorder %s2287_s17, %s1935_s25  ;;  %p1911_p6 = scmp.lt.u32.totalorder %s2287_s17, %s2761_s1 }
  0x2a   : > { %p1912_p7 = scmp.lt.u32.totalorder %s1910_s27, %s1935_s25  ;;  %p1914_p13 = scmp.lt.u32.totalorder %s1935_s25, %s2287_s17 }
  0x2b   : > { %p1908_p4 = pnand %p2298_p3, %p1906_p2 }
  0x2c   : > { %p1913_p10 = por %p1912_p7, %p1911_p6 }
  0x2d   : > { %p1909_p5 = pneg %p1908_p4 }
  0x2e   : > { %p1915_p12 = por %p1914_p13, %p1913_p10 }
  0x30   : > { %p1916_p1 = pnand %p1915_p12, %p1909_p5 }
  0x32   : > { %1919 = shalt.err (!%p1916_p1)
}
  0x33   : > { %s1920_s13 = scalar_lea.vmem %s2290_s29, 64  ;;  %s2145_s16 = smov [#allocation5]  }
  0x34   : > { %p1921_p2 = scmp.ne.s32.totalorder %s2290_s29, %s1920_s13  ;;  %s1925_s14 = sshll.u32 %s2145_s16, 4  ;;  %s1926_s14 = int_to_ptr.vmem [resolvable:$false] %s1925_s14 }
  0x35   : > { %s1927_s22 = scalar_lea.vmem %s1926_s14, 128  ;;  %p1928_p9 = scmp.lt.s32.totalorder %s2290_s29, %s1926_s14 }
  0x36   : > { %p1923_p4 = pnand %p1921_p2, %p2298_p3  ;;  %p1929_p8 = scmp.lt.s32.totalorder %s1927_s22, %s1920_s13 }
  0x38   : > { %p1924_p11 = pneg %p1923_p4  ;;  %p1930_p6 = por %p1929_p8, %p1928_p9 }
  0x3a   : > { %p1931_p7 = pnand %p1930_p6, %p1924_p11 }
  0x3c   : > { %1934 = shalt.err (!%p1931_p7)
}
  0x3d   : > { %1789 = dma.hbm_to_vmem [thread:$0]  (!%p2278_p0), %s2287_s17, 64, %s2290_s29, %s2293_s28  }
  0x3e   : > { %p277_p12 = scmp.lt.s32.totalorder %s2143_s23, 3  ;;  %p2763_p1 = scmp.ge.s32.totalorder %s2143_s23, 1 }
  0x3f   : > { %s2765_s0 = sld [smem:[#allocation22_spill]]  ;;  %s226_s13 = scalar_lea.vmem [#allocation2], %s2271_s10 }
  0x40   : > { %p2325_p5 = pnand %p2763_p1, %p277_p12  ;;  %s234_s16 = sshll.u32 %s226_s13, 4  ;;  %s235_s16 = int_to_ptr.vmem [resolvable:$true] %s234_s16 }
  0x41   : > { %s2766_s14 = sand.u32 1, %s2131_s20  }
  0x42   : > { %s2764_s25 = scalar_select %p2325_p5, 1, 0 }
  0x43   : > { %s223_s17 = scalar_lea.sflag [#allocation3], %s2766_s14 }
  0x45   : > { %s2333_s27 = scalar_lea.hbm %s2765_s0, %s2274_s11  ;;  %s1941_s26 = scalar_lea.hbm %s2765_s0, 384 }
  0x46   : > { %s1936_s29 = scalar_lea.hbm %s2333_s27, 64  ;;  %p1942_p10 = scmp.lt.u32.totalorder %s2333_s27, %s2765_s0 }
  0x47   : > { %p1937_p8 = scmp.ne.s32.totalorder %s2333_s27, %s1936_s29  ;;  %p1943_p13 = scmp.lt.u32.totalorder %s1941_s26, %s1936_s29 }
  0x48   : > { %p1945_p4 = scmp.lt.u32.totalorder %s1936_s29, %s2333_s27 }
  0x49   : > { %p1939_p9 = pnand %p1937_p8, %p2298_p3  ;;  %p1944_p2 = por %p1943_p13, %p1942_p10 }
  0x4b   : > { %p1940_p11 = pneg %p1939_p9  ;;  %p1946_p6 = por %p1945_p4, %p1944_p2 }
  0x4d   : > { %p1947_p7 = pnand %p1946_p6, %p1940_p11 }
  0x4f   : > { %1950 = shalt.err (!%p1947_p7)
}
  0x50   : > { %s1951_s13 = scalar_lea.vmem %s235_s16, 64  ;;  %s2146_s14 = smov [#allocation2]  }
  0x51   : > { %p1952_p12 = scmp.ne.s32.totalorder %s235_s16, %s1951_s13  ;;  %s1956_s20 = sshll.u32 %s2146_s14, 4  ;;  %s1957_s20 = int_to_ptr.vmem [resolvable:$false] %s1956_s20 }
  0x52   : > { %s1958_s1 = scalar_lea.vmem %s1957_s20, 128  ;;  %p1959_p9 = scmp.lt.s32.totalorder %s235_s16, %s1957_s20 }
  0x53   : > { %p1954_p1 = pnand %p1952_p12, %p2298_p3  ;;  %p1960_p5 = scmp.lt.s32.totalorder %s1958_s1, %s1951_s13 }
  0x55   : > { %p1955_p8 = pneg %p1954_p1  ;;  %p1961_p0 = por %p1960_p5, %p1959_p9 }
  0x57   : > { %p1962_p10 = pnand %p1961_p0, %p1955_p8 }
  0x59   : > { %1965 = shalt.err (!%p1962_p10)
}
  0x5a   : > { %p2767_p13 = scmp.ne.s32.totalorder %s2760_s12, 0  ;;  %s1455_s22 = scalar_lea.hbm %s2732_s2, %s2274_s11 }
  0x5b   : > { %s264_s26 = scalar_lea.vmem [#allocation7], %s2271_s10  ;;  %s1456_s14 = scalar_lea.hbm %s1455_s22, 256 }
  0x5c   : > { %1786 = dma.hbm_to_vmem [thread:$0]  (!%p2767_p13), %s2333_s27, 64, %s235_s16, %s223_s17  }
  0x5d   : > { %s272_s15 = sshll.u32 %s264_s26, 4  ;;  %s1996_s20 = scalar_lea.hbm %s1455_s22, 320  ;;  %s273_s15 = int_to_ptr.vmem [resolvable:$true] %s272_s15 }
  0x5e   : > { %p1967_p11 = scmp.ne.s32.totalorder %s1456_s14, %s1996_s20  ;;  %s1971_s0 = scalar_lea.hbm %s2732_s2, 384 }
  0x5f   : > { %p1972_p2 = scmp.lt.u32.totalorder %s1456_s14, %s2732_s2  ;;  %p1973_p4 = scmp.lt.u32.totalorder %s1971_s0, %s1996_s20 }
  0x60   : > { %p1969_p0 = pnand %p1967_p11, %p2298_p3  ;;  %p1975_p7 = scmp.lt.u32.totalorder %s1996_s20, %s1456_s14 }
  0x61   : > { %p1974_p6 = por %p1973_p4, %p1972_p2 }
  0x62   : > { %p1970_p5 = pneg %p1969_p0 }
  0x63   : > { %p1976_p12 = por %p1975_p7, %p1974_p6 }
  0x65   : > { %p1977_p1 = pnand %p1976_p12, %p1970_p5 }
  0x67   : > { %1980 = shalt.err (!%p1977_p1)
}
  0x68   : > { %s1981_s10 = scalar_lea.vmem %s273_s15, 64  ;;  %s2147_s11 = smov [#allocation7]  }
  0x69   : > { %p1982_p8 = scmp.ne.s32.totalorder %s273_s15, %s1981_s10  ;;  %s1986_s27 = sshll.u32 %s2147_s11, 4  ;;  %s1987_s27 = int_to_ptr.vmem [resolvable:$false] %s1986_s27 }
  0x6a   : > { %s1988_s16 = scalar_lea.vmem %s1987_s27, 128  ;;  %p1989_p11 = scmp.lt.s32.totalorder %s273_s15, %s1987_s27 }
  0x6b   : > { %p1984_p9 = pnand %p1982_p8, %p2298_p3  ;;  %p1990_p0 = scmp.lt.s32.totalorder %s1988_s16, %s1981_s10 }
  0x6d   : > { %p1985_p10 = pneg %p1984_p9  ;;  %p1991_p13 = por %p1990_p0, %p1989_p11 }
  0x6f   : > { %p1992_p2 = pnand %p1991_p13, %p1985_p10 }
  0x71   : > { %1995 = shalt.err (!%p1992_p2)
}
  0x72   : > { %p2768_p4 = scmp.ne.s32.totalorder %s2760_s12, 0  ;;  %p2769_p5 = scmp.ne.s32.totalorder %s2764_s25, 0 }
  0x73   : > { %s2376_s0 = sand.u32 (!%p2769_p5), 1, %s2127_s19   ;;  %p2770_p3 = scmp.ne.s32.totalorder (!%p2769_p5), %s2755_s30, 0 }
  0x74   : > { %1792 = dma.hbm_to_vmem [thread:$0]  (!%p2768_p4), %s1456_s14, 64, %s273_s15, %s2293_s28  }
  0x75   : > { %281 = sbr.rel (%p2769_p5) target bundleno = 1665 (0x681), region = 32  ;;  %s2379_s23 = sshll.u32 (!%p2769_p5), %s2376_s0, 2 }
  0x76   : > { %s284_s8 = scalar_lea.sflag (!%p2769_p5), [#allocation3], %s2376_s0  ;;  %s287_s9 = scalar_lea.vmem (!%p2769_p5), [#allocation2], %s2379_s23 }
  0x7c   : > { %2106 = dma.done.wait (%p2770_p3), %s284_s8, 64  }
  0x7d   : > { %2108 = vsyncadd (%p2770_p3), %s284_s8, 4294967232  ;;  %s292_s12 = sand.u32 1, %s2229_s24   ;;  %s296_s25 = scalar_lea.vmem [#allocation5], %s2379_s23 }
  0x7e   : > { %s293_s28 = scalar_lea.sflag [#allocation6], %s292_s12 }
  0x7f   : > { %2110 = dma.done.wait (%p2770_p3), %s293_s28, 128  }
  0x80   : > { %2112 = vsyncadd (%p2770_p3), %s293_s28, 4294967168  ;;  %v2148_v0 = vmov 0.0   ;;  %vm2149_vm0 = vmmov 0   ;;  %vm356_vm1 = vcmask 31744   ;;  %v354_v1 = vld [vmem:[%s296_s25] sm:$0xf] }
  0x81   : > { %1675 = vmatprep.subr.bf16.mxu0 %v2148_v0  ;;  %1677 = vmatprep.mubr.msk.bf16.mxu0 %vm2149_vm0, %v2148_v0  ;;  %v361_v2 = vsel %vm356_vm1, %v354_v1, 0  ;;  %v353_v3 = vld [vmem:[%s287_s9] sm:$0xf]  ;;  %s1596_s30 = sshll.u32 %s2376_s0, 5  ;;  %vm403_vm2 = vcmask 64512   ;;  %vm465_vm3 = vcmask 60416   ;;  %v1601_v10 = vcombine.low %v354_v1, %v354_v1 }
  0x82   : > { %1681 = vmatprep.subr.bf16.mxu1 %v2148_v0  ;;  %1683 = vmatprep.mubr.msk.bf16.mxu1 %vm2149_vm0, %v2148_v0  ;;  %s2410_s17 = scalar_lea.vmem [#allocation11], %s1596_s30  ;;  %v1600_v11 = vcombine.low %v353_v3, %v353_v3  ;;  %s2150_s7 = smov 124   ;;  %vm420_vm4 = vcmask 1043456  }
  0x83   : > { %1676 = vmatpush3.bf16.xpose.msra.mxu0 %v361_v2  ;;  %476 = vrot.lane.b32.xlu1 %v1601_v10, %s2150_s7  ;;  %s2151_s29 = smov 120   ;;  %s2152_s22 = smov 116  }
  0x84   : > { %1693 = vmatprep.subr.bf16.mxu0 %v2148_v0  ;;  %s2153_s26 = smov 112   ;;  %s2154_s15 = smov 108  }
  0x85   : > { %s2155_s14 = smov 104   ;;  %s2156_s20 = smov 100  }
  0x86   : > { %s305_s13 = scalar_lea.vmem [#allocation7], %s2379_s23  ;;  %s2438_s1 = scalar_lea.vmem [#allocation9], %s1596_s30 }
  0x87   : > { %471 = vrot.lane.b32.xlu1 %v1600_v11, %s2150_s7  ;;  %v2426_v17 = vld [vmem:[%s305_s13] sm:$0xf]  ;;  %s2157_s10 = smov 4   ;;  %s2158_s11 = smov 8  }
  0x88   : > { %v422_v18 = vsel %vm420_vm4, %v2426_v17, 0  ;;  %s2159_s27 = smov 12   ;;  %s2160_s16 = smov 16  }
  0x89   : > { %1682 = vmatpush3.bf16.msra.mxu1 %v422_v18  ;;  %s2161_s8 = smov 20   ;;  %s1388_s9 = sshll.u32 %s2410_s17, 4  ;;  %s2637_s9 = int_to_ptr.vmem [resolvable:$true] %s1388_s9 }
  0x8a   : > { %1678 = vmatmul.mubr.msk.bf16.vlgmr.msra.gmra.mrb[0].mxu0 %vm356_vm1, %v353_v3  ;;  %1687 = vmatprep.subr.bf16.mxu1 %v2148_v0  ;;  %s1641_s28 = sshll.u32 %s2135_s21, 9  ;;  %p2771_p6 = scmp.ne.s32.totalorder %s2756_s6, 0 }
  0x8b   : > { %1695 = vmatprep.mubr.msk.bf16.mxu0 %vm2149_vm0, %v2148_v0  ;;  %593 = vrot.lane.b32.xlu1 %v1600_v11, %s2151_s29 }
  0x8f   : > { %711 = vrot.lane.b32.xlu1 %v1601_v10, %s2152_s22 }
  0x93   : > { %709 = vrot.lane.b32.xlu1 %v1600_v11, %s2152_s22 }
  0x97   : > { %827 = vrot.lane.b32.xlu1 %v1601_v10, %s2153_s26 }
  0x9b   : > { %825 = vrot.lane.b32.xlu1 %v1600_v11, %s2153_s26 }
  0x9f   : > { %943 = vrot.lane.b32.xlu1 %v1601_v10, %s2154_s15 }
  0xa3   : > { %1059 = vrot.lane.b32.xlu1 %v1601_v10, %s2155_s14 }
  0xa7   : > { %1175 = vrot.lane.b32.xlu1 %v1601_v10, %s2156_s20 }
  0xf5   : > { %v477_v20 = vpop.permute.xlu1 %476 }
  0xf6   : > { %v482_v27 = vsel %vm356_vm1, %v477_v20, 0 }
  0xf9   : > { %v472_v21 = vpop.permute.xlu1 %471 }
  0xfd   : > { %v594_v25 = vpop.permute.xlu1 %593 }
 0x101   : > { %v712_v29 = vpop.permute.xlu1 %711 }
 0x102   : > { %v717_v32 = vsel %vm356_vm1, %v712_v29, 0  ;;  %v1603_v29 = vcombine.low %v2426_v17, %v2426_v17 }
 0x105   : > { %v710_v31 = vpop.permute.xlu1 %709 }
 0x109   : > { %v828_v33 = vpop.permute.xlu1 %827 }
 0x10a   : > { %v833_v35 = vsel %vm356_vm1, %v828_v33, 0 }
 0x10d   : > { %v826_v34 = vpop.permute.xlu1 %825 }
 0x111   : > { %v944_v36 = vpop.permute.xlu1 %943 }
 0x112   : > { %v949_v37 = vsel %vm356_vm1, %v944_v36, 0 }
 0x115   : > { %v1060_v38 = vpop.permute.xlu1 %1059 }
 0x116   : > { %v1065_v40 = vsel %vm356_vm1, %v1060_v38, 0 }
 0x119   : > { %v1176_v41 = vpop.permute.xlu1 %1175 }
 0x11a   : > { %v1181_v43 = vsel %vm356_vm1, %v1176_v41, 0 }
 0x15d   : > { %v397_v4 = vpop.f32.mrb[0].mxu0 }
 0x15e   : > { %v464_v5 = vpack.c.bf16 %v397_v4, %v397_v4  ;;  %v1679_v6 = vpop.f32.mrb[1].mxu0  ;;  %v404_v7 = vsel %vm403_vm2, %v397_v4, -inf }
 0x15f   : > { %405 = vmax.xlane.f32.xlu0 %v404_v7  ;;  %v400_v8 = vpop.f32.mrb[2].mxu0 }
 0x160   : > { %466 = vst.msk [vmem:[%s2410_s17] sm:$0xf] %vm465_vm3, %v464_v5  ;;  %v1680_v9 = vpop.f32.mrb[3].mxu0 }
 0x1ec   : > { %v406_v12 = vpop.xlane.xlu0 %405 }
 0x1ed   : > { %v407_v13 = vsub.f32 %v397_v4, %v406_v12 }
 0x1ef   : > { %v408_v14 = vmul.f32 1.442695, %v407_v13 }
 0x1f1   : > { %1873 = vpow2.f32 %v408_v14 }
 0x1fb   : > { %v1874_v15 = vpop.eup %1873 }
 0x1fc   : > { %v410_v16 = vsel %vm403_vm2, %v1874_v15, 0.0 }
 0x1fd   : > { %411 = vadd.xlane.f32.xlu0 %v410_v16 }
 0x213   : > { %595 = vrot.lane.b32.xlu0 %v1601_v10, %s2151_s29 }
 0x217   : > { %941 = vrot.lane.b32.xlu0 %v1600_v11, %s2154_s15 }
 0x21b   : > { %1057 = vrot.lane.b32.xlu0 %v1600_v11, %s2155_s14 }
 0x21f   : > { %1173 = vrot.lane.b32.xlu0 %v1600_v11, %s2156_s20 }
 0x28a   : > { %v412_v19 = vpop.xlane.xlu0 %411 }
 0x28b   : > { %1875 = vrcp.f32 %v412_v19 }
 0x28e   : > { %v596_v28 = vpop.permute.xlu0 %595 }
 0x28f   : > { %v601_v30 = vsel %vm356_vm1, %v596_v28, 0 }
 0x292   : > { %v942_v39 = vpop.permute.xlu0 %941 }
 0x295   : > { %v1876_v22 = vpop.eup %1875 }
 0x296   : > { %v414_v23 = vmul.f32 0.17677669, %v1876_v22  ;;  %v1058_v42 = vpop.permute.xlu0 %1057 }
 0x298   : > { %v415_v24 = vmul.f32 %v1874_v15, %v414_v23 }
 0x29a   : > { %v416_v26 = vpack.c.bf16 %v415_v24, %v415_v24  ;;  %v1174_v44 = vpop.permute.xlu0 %1173 }
 0x29c   : > { %467 = vst.msk [vmem:[%s2438_s1] sm:$0xf] %vm465_vm3, %v416_v26  ;;  %1684 = vmatmul.mubr.msk.bf16.vlgmr.msra.gmra.mrb[0].mxu1 %vm403_vm2, %v416_v26 }
 0x29d   : > { %1688 = vmatpush3.bf16.xpose.msra.mxu1 %v482_v27  ;;  %1689 = vmatprep.mubr.msk.bf16.mxu1 %vm2149_vm0, %v2148_v0 }
 0x29e   : > { %1699 = vmatprep.subr.bf16.mxu1 %v2148_v0 }
 0x2a4   : > { %1690 = vmatmul.mubr.msk.bf16.vlgmr.msra.gmra.mrb[4].mxu1 %vm356_vm1, %v472_v21 }
 0x2a5   : > { %1700 = vmatpush3.bf16.xpose.msra.mxu1 %v601_v30  ;;  %1701 = vmatprep.mubr.msk.bf16.mxu1 %vm2149_vm0, %v2148_v0 }
 0x2a6   : > { %1711 = vmatprep.subr.bf16.mxu1 %v2148_v0 }
 0x2ac   : > { %1702 = vmatmul.mubr.msk.bf16.vlgmr.msra.gmra.mrb[8].mxu1 %vm356_vm1, %v594_v25 }
 0x2ad   : > { %1712 = vmatpush3.bf16.xpose.msra.mxu1 %v717_v32  ;;  %1713 = vmatprep.mubr.msk.bf16.mxu1 %vm2149_vm0, %v2148_v0 }
 0x2ae   : > { %1723 = vmatprep.subr.bf16.mxu1 %v2148_v0 }
 0x2b4   : > { %1714 = vmatmul.mubr.msk.bf16.vlgmr.msra.gmra.mrb[12].mxu1 %vm356_vm1, %v710_v31 }
 0x2b5   : > { %1724 = vmatpush3.bf16.xpose.msra.mxu1 %v833_v35  ;;  %1725 = vmatprep.mubr.msk.bf16.mxu1 %vm2149_vm0, %v2148_v0 }
 0x2b6   : > { %1735 = vmatprep.subr.bf16.mxu1 %v2148_v0 }
 0x2bc   : > { %1726 = vmatmul.mubr.msk.bf16.vlgmr.msra.gmra.mrb[16].mxu1 %vm356_vm1, %v826_v34 }
 0x2bd   : > { %1736 = vmatpush3.bf16.xpose.msra.mxu1 %v949_v37  ;;  %1737 = vmatprep.mubr.msk.bf16.mxu1 %vm2149_vm0, %v2148_v0 }
 0x2be   : > { %1747 = vmatprep.subr.bf16.mxu1 %v2148_v0 }
 0x2c4   : > { %1738 = vmatmul.mubr.msk.bf16.vlgmr.msra.gmra.mrb[20].mxu1 %vm356_vm1, %v942_v39 }
 0x2c5   : > { %1748 = vmatpush3.bf16.xpose.msra.mxu1 %v1065_v40  ;;  %1749 = vmatprep.mubr.msk.bf16.mxu1 %vm2149_vm0, %v2148_v0 }
 0x2c6   : > { %1759 = vmatprep.subr.bf16.mxu1 %v2148_v0 }
 0x2cc   : > { %1750 = vmatmul.mubr.msk.bf16.vlgmr.msra.gmra.mrb[24].mxu1 %vm356_vm1, %v1058_v42 }
 0x2cd   : > { %1760 = vmatpush3.bf16.xpose.msra.mxu1 %v1181_v43  ;;  %1761 = vmatprep.mubr.msk.bf16.mxu1 %vm2149_vm0, %v2148_v0 }
 0x2d4   : > { %1762 = vmatmul.mubr.msk.bf16.vlgmr.msra.gmra.mrb[28].mxu1 %vm356_vm1, %v1174_v44 }
 0x36f   : > { %v2476_v45 = vpop.f32.mrb[0].mxu1 }
 0x370   : > { %v1685_v46 = vpop.f32.mrb[1].mxu1 }
 0x371   : > { %v461_v47 = vpop.f32.mrb[2].mxu1 }
 0x372   : > { %v1686_v48 = vpop.f32.mrb[3].mxu1 }
 0x377   : > { %v518_v49 = vpop.f32.mrb[4].mxu1 }
 0x378   : > { %v588_v50 = vpack.c.bf16 %v518_v49, %v518_v49  ;;  %v1691_v51 = vpop.f32.mrb[5].mxu1  ;;  %v524_v52 = vsel %vm403_vm2, %v518_v49, -inf }
 0x379   : > { %525 = vmax.xlane.f32.xlu1 %v524_v52  ;;  %v521_v53 = vpop.f32.mrb[6].mxu1 }
 0x37a   : > { %1605 = vst.msk [vmem:[%s2410_s17 + $0x4] sm:$0xf] %vm465_vm3, %v588_v50  ;;  %v1692_v54 = vpop.f32.mrb[7].mxu1 }
 0x37f   : > { %v637_v55 = vpop.f32.mrb[8].mxu1 }
 0x380   : > { %v704_v56 = vpack.c.bf16 %v637_v55, %v637_v55  ;;  %v1703_v57 = vpop.f32.mrb[9].mxu1  ;;  %v643_v58 = vsel %vm403_vm2, %v637_v55, -inf }
 0x381   : > { %644 = vmax.xlane.f32.xlu0 %v643_v58  ;;  %v640_v59 = vpop.f32.mrb[10].mxu1 }
 0x382   : > { %1609 = vst.msk [vmem:[%s2410_s17 + $0x8] sm:$0xf] %vm465_vm3, %v704_v56  ;;  %v1704_v60 = vpop.f32.mrb[11].mxu1 }
 0x387   : > { %v753_v61 = vpop.f32.mrb[12].mxu1 }
 0x388   : > { %v820_v62 = vpack.c.bf16 %v753_v61, %v753_v61  ;;  %v759_v63 = vsel %vm403_vm2, %v753_v61, -inf  ;;  %v1715_v1 = vpop.f32.mrb[13].mxu1 }
 0x389   : > { %760 = vmax.xlane.f32.xlu0 %v759_v63  ;;  %v756_v2 = vpop.f32.mrb[14].mxu1 }
 0x38a   : > { %1613 = vst.msk [vmem:[%s2410_s17 + $0xc] sm:$0xf] %vm465_vm3, %v820_v62  ;;  %v1716_v3 = vpop.f32.mrb[15].mxu1 }
 0x38f   : > { %v2487_v4 = vpop.f32.mrb[16].mxu1 }
 0x390   : > { %v936_v5 = vpack.c.bf16 %v2487_v4, %v2487_v4  ;;  %v875_v6 = vsel %vm403_vm2, %v2487_v4, -inf  ;;  %v1727_v7 = vpop.f32.mrb[17].mxu1 }
 0x391   : > { %876 = vmax.xlane.f32.xlu1 %v875_v6  ;;  %v872_v8 = vpop.f32.mrb[18].mxu1 }
 0x392   : > { %1617 = vst.msk [vmem:[%s2410_s17 + $0x10] sm:$0xf] %vm465_vm3, %v936_v5  ;;  %v1728_v9 = vpop.f32.mrb[19].mxu1 }
 0x397   : > { %v2495_v10 = vpop.f32.mrb[20].mxu1 }
 0x398   : > { %v1052_v11 = vpack.c.bf16 %v2495_v10, %v2495_v10  ;;  %v991_v12 = vsel %vm403_vm2, %v2495_v10, -inf  ;;  %v1739_v13 = vpop.f32.mrb[21].mxu1 }
 0x399   : > { %992 = vmax.xlane.f32.xlu0 %v991_v12  ;;  %v988_v14 = vpop.f32.mrb[22].mxu1 }
 0x39a   : > { %1621 = vst.msk [vmem:[%s2410_s17 + $0x14] sm:$0xf] %vm465_vm3, %v1052_v11  ;;  %v1740_v15 = vpop.f32.mrb[23].mxu1 }
 0x39f   : > { %v1101_v16 = vpop.f32.mrb[24].mxu1 }
 0x3a0   : > { %v1168_v18 = vpack.c.bf16 %v1101_v16, %v1101_v16  ;;  %v1107_v19 = vsel %vm403_vm2, %v1101_v16, -inf  ;;  %v1751_v20 = vpop.f32.mrb[25].mxu1 }
 0x3a1   : > { %1108 = vmax.xlane.f32.xlu1 %v1107_v19  ;;  %v1104_v21 = vpop.f32.mrb[26].mxu1 }
 0x3a2   : > { %1625 = vst.msk [vmem:[%s2410_s17 + $0x18] sm:$0xf] %vm465_vm3, %v1168_v18  ;;  %v1752_v22 = vpop.f32.mrb[27].mxu1 }
 0x3a7   : > { %v1217_v23 = vpop.f32.mrb[28].mxu1 }
 0x3a8   : > { %v1284_v24 = vpack.c.bf16 %v1217_v23, %v1217_v23  ;;  %v1223_v25 = vsel %vm403_vm2, %v1217_v23, -inf  ;;  %v1763_v26 = vpop.f32.mrb[29].mxu1 }
 0x3a9   : > { %1224 = vmax.xlane.f32.xlu0 %v1223_v25  ;;  %v1220_v27 = vpop.f32.mrb[30].mxu1 }
 0x3aa   : > { %1629 = vst.msk [vmem:[%s2410_s17 + $0x1c] sm:$0xf] %vm465_vm3, %v1284_v24  ;;  %v1764_v28 = vpop.f32.mrb[31].mxu1 }
 0x3b2   : > { %540 = vrot.lane.b32.xlu1 %v1603_v29, %s2150_s7  ;;  %s2601_s7 = scalar_lea.hbm %s2734_s4, %s1641_s28 }
 0x3bf   : > { %656 = vrot.lane.b32.xlu0 %v1603_v29, %s2151_s29  ;;  %s1371_s29 = sshll.u32 %s2438_s1, 4  ;;  %s2604_s29 = int_to_ptr.vmem [resolvable:$true] %s1371_s29 }
 0x406   : > { %v526_v30 = vpop.xlane.xlu1 %525 }
 0x407   : > { %v527_v31 = vsub.f32 %v518_v49, %v526_v30 }
 0x409   : > { %v528_v32 = vmul.f32 1.442695, %v527_v31 }
 0x40b   : > { %1877 = vpow2.f32 %v528_v32 }
 0x40e   : > { %v645_v33 = vpop.xlane.xlu0 %644 }
 0x40f   : > { %v646_v34 = vsub.f32 %v637_v55, %v645_v33 }
 0x411   : > { %v647_v35 = vmul.f32 1.442695, %v646_v34 }
 0x413   : > { %1879 = vpow2.f32 %v647_v35 }
 0x415   : > { %v1878_v36 = vpop.eup %1877 }
 0x416   : > { %v761_v37 = vpop.xlane.xlu0 %760  ;;  %v530_v38 = vsel %vm403_vm2, %v1878_v36, 0.0 }
 0x417   : > { %v762_v39 = vsub.f32 %v753_v61, %v761_v37  ;;  %531 = vadd.xlane.f32.xlu1 %v530_v38 }
 0x419   : > { %v763_v40 = vmul.f32 1.442695, %v762_v39 }
 0x41b   : > { %1881 = vpow2.f32 %v763_v40 }
 0x41d   : > { %v1880_v17 = vpop.eup %1879 }
 0x41e   : > { %v649_v41 = vsel %vm403_vm2, %v1880_v17, 0.0  ;;  %v877_v44 = vpop.xlane.xlu1 %876 }
 0x41f   : > { %650 = vadd.xlane.f32.xlu0 %v649_v41  ;;  %v878_v49 = vsub.f32 %v2487_v4, %v877_v44 }
 0x421   : > { %v879_v51 = vmul.f32 1.442695, %v878_v49 }
 0x423   : > { %1883 = vpow2.f32 %v879_v51 }
 0x425   : > { %v2515_v42 = vpop.eup %1881 }
 0x426   : > { %v765_v43 = vsel %vm403_vm2, %v2515_v42, 0.0  ;;  %v993_v50 = vpop.xlane.xlu0 %992 }
 0x427   : > { %766 = vadd.xlane.f32.xlu1 %v765_v43  ;;  %v994_v52 = vsub.f32 %v2495_v10, %v993_v50 }
 0x429   : > { %v995_v55 = vmul.f32 1.442695, %v994_v52 }
 0x42b   : > { %1885 = vpow2.f32 %v995_v55 }
 0x42d   : > { %v2525_v59 = vpop.eup %1883 }
 0x42e   : > { %v1109_v46 = vpop.xlane.xlu1 %1108  ;;  %v881_v60 = vsel %vm403_vm2, %v2525_v59, 0.0 }
 0x42f   : > { %v1110_v54 = vsub.f32 %v1101_v16, %v1109_v46 }
 0x431   : > { %v1111_v57 = vmul.f32 1.442695, %v1110_v54 }
 0x432   : > { %v541_v47 = vpop.permute.xlu1 %540 }
 0x433   : > { %v546_v48 = vsel %vm420_vm4, %v541_v47, 0  ;;  %1887 = vpow2.f32 %v1111_v57 }
 0x434   : > { %1694 = vmatpush3.bf16.msra.mxu0 %v546_v48 }
 0x435   : > { %772 = vrot.lane.b32.xlu0 %v1603_v29, %s2152_s22  ;;  %1705 = vmatprep.subr.bf16.mxu0 %v2148_v0  ;;  %v2529_v61 = vpop.eup %1885  ;;  %s2608_s22 = scalar_lea.sflag [#allocation10], %s292_s12 }
 0x436   : > { %v1225_v53 = vpop.xlane.xlu0 %1224  ;;  %v997_v63 = vsel %vm403_vm2, %v2529_v61, 0.0 }
 0x437   : > { %v1226_v56 = vsub.f32 %v1217_v23, %v1225_v53 }
 0x438   : > { %888 = vrot.lane.b32.xlu1 %v1603_v29, %s2153_s26  ;;  %s1997_s26 = scalar_lea.vmem %s2604_s29, 512 }
 0x439   : > { %v1227_v58 = vmul.f32 1.442695, %v1226_v56  ;;  %p1998_p13 = scmp.ne.s32.totalorder %s2604_s29, %s1997_s26 }
 0x43a   : > { %v657_v5 = vpop.permute.xlu0 %656 }
 0x43b   : > { %1889 = vpow2.f32 %v1227_v58  ;;  %v662_v12 = vsel %vm420_vm4, %v657_v5, 0  ;;  %p1999_p7 = pnand %p1998_p13, %p2771_p6 }
 0x43d   : > { %v2531_v62 = vpop.eup %1887  ;;  %p2000_p12 = pneg %p1999_p7 }
 0x43e   : > { %v1113_v2 = vsel %vm403_vm2, %v2531_v62, 0.0 }
 0x445   : > { %v2535_v1 = vpop.eup %1889 }
 0x446   : > { %v1229_v3 = vsel %vm403_vm2, %v2535_v1, 0.0 }
 0x454   : > { %882 = vadd.xlane.f32.xlu0 %v881_v60 }
 0x458   : > { %998 = vadd.xlane.f32.xlu0 %v997_v63 }
 0x45c   : > { %1114 = vadd.xlane.f32.xlu1 %v1113_v2  ;;  %1230 = vadd.xlane.f32.xlu0 %v1229_v3 }
 0x46d   : > { %1120 = vrot.lane.b32.xlu1 %v1603_v29, %s2155_s14 }
 0x471   : > { %1236 = vrot.lane.b32.xlu1 %v1603_v29, %s2156_s20 }
 0x472   : > { %1004 = vrot.lane.b32.xlu0 %v1603_v29, %s2154_s15  ;;  %s2162_s15 = smov [#allocation9]  }
 0x473   : > { %s2001_s14 = sshll.u32 %s2162_s15, 4  ;;  %s2002_s14 = int_to_ptr.vmem [resolvable:$false] %s2001_s14 }
 0x474   : > { %s2003_s20 = scalar_lea.vmem %s2002_s14, 1024  ;;  %p2004_p1 = scmp.lt.s32.totalorder %s2604_s29, %s2002_s14 }
 0x475   : > { %p2005_p8 = scmp.lt.s32.totalorder %s2003_s20, %s1997_s26 }
 0x477   : > { %p2006_p9 = por %p2005_p8, %p2004_p1 }
 0x479   : > { %p2007_p10 = pnand %p2006_p9, %p2000_p12 }
 0x4a4   : > { %v532_v4 = vpop.xlane.xlu1 %531 }
 0x4a5   : > { %1891 = vrcp.f32 %v532_v4 }
 0x4ac   : > { %v651_v6 = vpop.xlane.xlu0 %650 }
 0x4ad   : > { %1893 = vrcp.f32 %v651_v6 }
 0x4af   : > { %v1892_v7 = vpop.eup %1891 }
 0x4b0   : > { %v534_v8 = vmul.f32 0.17677669, %v1892_v7  ;;  %v773_v16 = vpop.permute.xlu0 %772 }
 0x4b1   : > { %v778_v19 = vsel %vm420_vm4, %v773_v16, 0 }
 0x4b2   : > { %v535_v9 = vmul.f32 %v1878_v36, %v534_v8 }
 0x4b4   : > { %v536_v10 = vpack.c.bf16 %v535_v9, %v535_v9  ;;  %v767_v11 = vpop.xlane.xlu1 %766 }
 0x4b5   : > { %1895 = vrcp.f32 %v767_v11 }
 0x4b6   : > { %1606 = vst.msk [vmem:[%s2438_s1 + $0x4] sm:$0xf] %vm465_vm3, %v536_v10  ;;  %1696 = vmatmul.mubr.msk.bf16.vlgmr.msra.gmra.mrb[4].mxu0 %vm403_vm2, %v536_v10 }
 0x4b7   : > { %v1894_v13 = vpop.eup %1893  ;;  %1706 = vmatpush3.bf16.msra.mxu0 %v662_v12  ;;  %1707 = vmatprep.mubr.msk.bf16.mxu0 %vm2149_vm0, %v2148_v0 }
 0x4b8   : > { %v653_v14 = vmul.f32 0.17677669, %v1894_v13  ;;  %1717 = vmatprep.subr.bf16.mxu0 %v2148_v0  ;;  %v889_v23 = vpop.permute.xlu1 %888 }
 0x4b9   : > { %v894_v25 = vsel %vm420_vm4, %v889_v23, 0 }
 0x4ba   : > { %v654_v15 = vmul.f32 %v1880_v17, %v653_v14 }
 0x4bc   : > { %v655_v18 = vpack.c.bf16 %v654_v15, %v654_v15 }
 0x4be   : > { %1610 = vst.msk [vmem:[%s2438_s1 + $0x8] sm:$0xf] %vm465_vm3, %v655_v18  ;;  %1708 = vmatmul.mubr.msk.bf16.vlgmr.msra.gmra.mrb[8].mxu0 %vm403_vm2, %v655_v18 }
 0x4bf   : > { %v1896_v20 = vpop.eup %1895  ;;  %1718 = vmatpush3.bf16.msra.mxu0 %v778_v19  ;;  %1719 = vmatprep.mubr.msk.bf16.mxu0 %vm2149_vm0, %v2148_v0 }
 0x4c0   : > { %v769_v21 = vmul.f32 0.17677669, %v1896_v20  ;;  %1729 = vmatprep.subr.bf16.mxu0 %v2148_v0 }
 0x4c2   : > { %v770_v22 = vmul.f32 %v2515_v42, %v769_v21 }
 0x4c4   : > { %v771_v24 = vpack.c.bf16 %v770_v22, %v770_v22 }
 0x4c6   : > { %1614 = vst.msk [vmem:[%s2438_s1 + $0xc] sm:$0xf] %vm465_vm3, %v771_v24  ;;  %1720 = vmatmul.mubr.msk.bf16.vlgmr.msra.gmra.mrb[12].mxu0 %vm403_vm2, %v771_v24 }
 0x4c7   : > { %1730 = vmatpush3.bf16.msra.mxu0 %v894_v25  ;;  %1731 = vmatprep.mubr.msk.bf16.mxu0 %vm2149_vm0, %v2148_v0 }
 0x4c8   : > { %1741 = vmatprep.subr.bf16.mxu0 %v2148_v0 }
 0x4e1   : > { %v883_v26 = vpop.xlane.xlu0 %882 }
 0x4e2   : > { %1897 = vrcp.f32 %v883_v26 }
 0x4e5   : > { %v999_v27 = vpop.xlane.xlu0 %998 }
 0x4e6   : > { %1899 = vrcp.f32 %v999_v27 }
 0x4e9   : > { %v1115_v28 = vpop.xlane.xlu1 %1114  ;;  %v1231_v29 = vpop.xlane.xlu0 %1230 }
 0x4ea   : > { %1901 = vrcp.f32 %v1115_v28 }
 0x4eb   : > { %1903 = vrcp.f32 %v1231_v29 }
 0x4ec   : > { %v1898_v30 = vpop.eup %1897 }
 0x4ed   : > { %v885_v31 = vmul.f32 0.17677669, %v1898_v30  ;;  %v1005_v32 = vpop.permute.xlu0 %1004  ;;  %v1121_v43 = vpop.permute.xlu1 %1120 }
 0x4ee   : > { %v1010_v37 = vsel %vm420_vm4, %v1005_v32, 0  ;;  %v1126_v48 = vsel %vm420_vm4, %v1121_v43, 0 }
 0x4ef   : > { %v886_v33 = vmul.f32 %v2525_v59, %v885_v31 }
 0x4f0   : > { %v1900_v34 = vpop.eup %1899 }
 0x4f1   : > { %v887_v35 = vpack.c.bf16 %v886_v33, %v886_v33  ;;  %v1001_v36 = vmul.f32 0.17677669, %v1900_v34  ;;  %v1237_v50 = vpop.permute.xlu1 %1236 }
 0x4f2   : > { %v1242_v51 = vsel %vm420_vm4, %v1237_v50, 0 }
 0x4f3   : > { %1618 = vst.msk [vmem:[%s2438_s1 + $0x10] sm:$0xf] %vm465_vm3, %v887_v35  ;;  %v1002_v38 = vmul.f32 %v2529_v61, %v1001_v36  ;;  %1732 = vmatmul.mubr.msk.bf16.vlgmr.msra.gmra.mrb[16].mxu0 %vm403_vm2, %v887_v35 }
 0x4f4   : > { %v1902_v39 = vpop.eup %1901  ;;  %1742 = vmatpush3.bf16.msra.mxu0 %v1010_v37  ;;  %1743 = vmatprep.mubr.msk.bf16.mxu0 %vm2149_vm0, %v2148_v0 }
 0x4f5   : > { %v1904_v40 = vpop.eup %1903  ;;  %v1003_v17 = vpack.c.bf16 %v1002_v38, %v1002_v38  ;;  %v1117_v41 = vmul.f32 0.17677669, %v1902_v39  ;;  %1753 = vmatprep.subr.bf16.mxu0 %v2148_v0 }
 0x4f6   : > { %v1233_v42 = vmul.f32 0.17677669, %v1904_v40 }
 0x4f7   : > { %1622 = vst.msk [vmem:[%s2438_s1 + $0x14] sm:$0xf] %vm465_vm3, %v1003_v17  ;;  %v1118_v44 = vmul.f32 %v2531_v62, %v1117_v41 }
 0x4f8   : > { %v1234_v46 = vmul.f32 %v2535_v1, %v1233_v42 }
 0x4f9   : > { %v1119_v47 = vpack.c.bf16 %v1118_v44, %v1118_v44 }
 0x4fa   : > { %v1235_v49 = vpack.c.bf16 %v1234_v46, %v1234_v46 }
 0x4fb   : > { %1626 = vst.msk [vmem:[%s2438_s1 + $0x18] sm:$0xf] %vm465_vm3, %v1119_v47  ;;  %1744 = vmatmul.mubr.msk.bf16.vlgmr.msra.gmra.mrb[20].mxu0 %vm403_vm2, %v1003_v17 }
 0x4fc   : > { %1630 = vst.msk [vmem:[%s2438_s1 + $0x1c] sm:$0xf] %vm465_vm3, %v1235_v49  ;;  %1754 = vmatpush3.bf16.msra.mxu0 %v1126_v48  ;;  %1755 = vmatprep.mubr.msk.bf16.mxu0 %vm2149_vm0, %v2148_v0 }
 0x4fd   : > { %1765 = vmatprep.subr.bf16.mxu0 %v2148_v0 }
 0x503   : > { %1756 = vmatmul.mubr.msk.bf16.vlgmr.msra.gmra.mrb[24].mxu0 %vm403_vm2, %v1119_v47 }
 0x504   : > { %1766 = vmatpush3.bf16.msra.mxu0 %v1242_v51  ;;  %1767 = vmatprep.mubr.msk.bf16.mxu0 %vm2149_vm0, %v2148_v0 }
 0x50b   : > { %1768 = vmatmul.mubr.msk.bf16.vlgmr.msra.gmra.mrb[28].mxu0 %vm403_vm2, %v1235_v49 }
 0x589   : > { %v582_v52 = vpop.f32.mrb[4].mxu0 }
 0x58a   : > { %1290 = vrot.lane.b32.xlu1 %v582_v52, %s2157_s10  ;;  %v1697_v53 = vpop.f32.mrb[5].mxu0 }
 0x58b   : > { %v585_v54 = vpop.f32.mrb[6].mxu0 }
 0x58c   : > { %v1698_v55 = vpop.f32.mrb[7].mxu0 }
 0x591   : > { %v698_v56 = vpop.f32.mrb[8].mxu0 }
 0x592   : > { %1294 = vrot.lane.b32.xlu1 %v698_v56, %s2158_s11  ;;  %v1709_v57 = vpop.f32.mrb[9].mxu0 }
 0x593   : > { %v701_v58 = vpop.f32.mrb[10].mxu0 }
 0x594   : > { %v1710_v59 = vpop.f32.mrb[11].mxu0 }
 0x599   : > { %v814_v60 = vpop.f32.mrb[12].mxu0 }
 0x59a   : > { %1298 = vrot.lane.b32.xlu0 %v814_v60, %s2159_s27  ;;  %v1721_v0 = vpop.f32.mrb[13].mxu0 }
 0x59b   : > { %v817_v61 = vpop.f32.mrb[14].mxu0 }
 0x59c   : > { %v1722_v62 = vpop.f32.mrb[15].mxu0 }
 0x5c6   : > { %v930_v63 = vpop.f32.mrb[16].mxu0 }
 0x5c7   : > { %1302 = vrot.lane.b32.xlu1 %v930_v63, %s2160_s16  ;;  %v1733_v1 = vpop.f32.mrb[17].mxu0 }
 0x5c8   : > { %v933_v2 = vpop.f32.mrb[18].mxu0 }
 0x5c9   : > { %v1734_v3 = vpop.f32.mrb[19].mxu0 }
 0x5ce   : > { %v1046_v4 = vpop.f32.mrb[20].mxu0 }
 0x5cf   : > { %1306 = vrot.lane.b32.xlu0 %v1046_v4, %s2161_s8  ;;  %v1745_v5 = vpop.f32.mrb[21].mxu0 }
 0x5d0   : > { %v1049_v6 = vpop.f32.mrb[22].mxu0 }
 0x5d1   : > { %v1746_v7 = vpop.f32.mrb[23].mxu0 }
 0x5d6   : > { %v1162_v8 = vpop.f32.mrb[24].mxu0 }
 0x5d7   : > { %2010 = shalt.err (!%p2007_p10)
}
 0x5d8   : > { %s2011_s24 = scalar_lea.hbm %s2601_s7, 512  ;;  %s2015_s1 = scalar_lea.hbm %s2734_s4, 1024 }
 0x5d9   : > { %p2012_p11 = scmp.ne.s32.totalorder %s2601_s7, %s2011_s24  ;;  %p2016_p4 = scmp.lt.u32.totalorder %s2601_s7, %s2734_s4 }
 0x5da   : > { %p2017_p5 = scmp.lt.u32.totalorder %s2015_s1, %s2011_s24  ;;  %p2019_p13 = scmp.lt.u32.totalorder %s2011_s24, %s2601_s7 }
 0x5db   : > { %p2013_p0 = pnand %p2012_p11, %p2771_p6 }
 0x5dc   : > { %p2018_p3 = por %p2017_p5, %p2016_p4 }
 0x5dd   : > { %p2014_p2 = pneg %p2013_p0 }
 0x5de   : > { %p2020_p7 = por %p2019_p13, %p2018_p3 }
 0x5e0   : > { %p2021_p12 = pnand %p2020_p7, %p2014_p2 }
 0x5e2   : > { %2024 = shalt.err (!%p2021_p12)
}
 0x5e3   : > { %s2163_s16 = smov 64   ;;  %s2164_s8 = smov 24   ;;  %v1757_v9 = vpop.f32.mrb[25].mxu0 }
 0x5e4   : > { %1778 = dma.vmem_to_hbm [thread:$0]  (%p2771_p6), %s2604_s29, 512, %s2601_s7, %s2608_s22, %s2163_s16, %s2163_s16, %s2157_s10   ;;  %v1165_v10 = vpop.f32.mrb[26].mxu0 }
 0x5e5   : > { %1310 = vrot.lane.b32.xlu1 %v1162_v8, %s2164_s8  ;;  %s2644_s26 = scalar_lea.hbm %s2735_s5, %s1641_s28  ;;  %v1758_v11 = vpop.f32.mrb[27].mxu0  ;;  %s2025_s15 = scalar_lea.vmem %s2637_s9, 512 }
 0x5e6   : > { %p2026_p1 = scmp.ne.s32.totalorder %s2637_s9, %s2025_s15  ;;  %s2165_s7 = smov [#allocation11]  }
 0x5e7   : > { %s2029_s17 = sshll.u32 %s2165_s7, 4  ;;  %s2030_s17 = int_to_ptr.vmem [resolvable:$false] %s2029_s17 }
 0x5e8   : > { %p2027_p8 = pnand %p2026_p1, %p2771_p6  ;;  %s2031_s29 = scalar_lea.vmem %s2030_s17, 1024 }
 0x5e9   : > { %p2032_p10 = scmp.lt.s32.totalorder %s2637_s9, %s2030_s17  ;;  %p2033_p11 = scmp.lt.s32.totalorder %s2031_s29, %s2025_s15 }
 0x5ea   : > { %p2028_p9 = pneg %p2027_p8 }
 0x5eb   : > { %p2034_p0 = por %p2033_p11, %p2032_p10 }
 0x5ed   : > { %p2035_p2 = pnand %p2034_p0, %p2028_p9 }
 0x5ef   : > { %2038 = shalt.err (!%p2035_p2)
}
 0x5f0   : > { %s2039_s28 = scalar_lea.hbm %s2644_s26, 512  ;;  %s2043_s24 = scalar_lea.hbm %s2735_s5, 1024 }
 0x5f1   : > { %p2040_p4 = scmp.ne.s32.totalorder %s2644_s26, %s2039_s28  ;;  %p2044_p13 = scmp.lt.u32.totalorder %s2644_s26, %s2735_s5 }
 0x5f2   : > { %p2045_p7 = scmp.lt.u32.totalorder %s2043_s24, %s2039_s28  ;;  %p2047_p1 = scmp.lt.u32.totalorder %s2039_s28, %s2644_s26 }
 0x5f3   : > { %p2041_p5 = pnand %p2040_p4, %p2771_p6 }
 0x5f4   : > { %p2046_p12 = por %p2045_p7, %p2044_p13 }
 0x5f5   : > { %p2042_p3 = pneg %p2041_p5 }
 0x5f6   : > { %p2048_p8 = por %p2047_p1, %p2046_p12 }
 0x5f8   : > { %p2049_p9 = pnand %p2048_p8, %p2042_p3 }
 0x5fa   : > { %2052 = shalt.err (!%p2049_p9)
}
 0x5fb   : > { %1779 = dma.vmem_to_hbm [thread:$0]  (%p2771_p6), %s2637_s9, 512, %s2644_s26, %s2608_s22, %s2163_s16, %s2163_s16, %s2157_s10   ;;  %v1278_v12 = vpop.f32.mrb[28].mxu0  ;;  %vm1319_vm5 = vcmask 97280   ;;  %vm1321_vm6 = vcmask 130048   ;;  %vm1323_vm7 = vcmask 162816   ;;  %vm1325_vm8 = vcmask 195584  }
 0x5fc   : > { %s2166_s1 = smov 28   ;;  %v1769_v13 = vpop.f32.mrb[29].mxu0  ;;  %v1291_v16 = vpop.permute.xlu1 %1290  ;;  %vm1327_vm9 = vcmask 228352   ;;  %s1634_s10 = sshll.u32 %s2135_s21, 6  ;;  %vm1330_vm10 = vcmask 257024  }
 0x5fd   : > { %1314 = vrot.lane.b32.xlu0 %v1278_v12, %s2166_s1  ;;  %v1281_v14 = vpop.f32.mrb[30].mxu0  ;;  %v1317_v21 = vsel %vm356_vm1, %v2476_v45, %v1291_v16  ;;  %s337_s9 = scalar_lea.vmem [#allocation8], %s2379_s23  ;;  %s2679_s16 = scalar_lea.hbm %s2733_s3, %s1634_s10 }
 0x5fe   : > { %v1770_v15 = vpop.f32.mrb[31].mxu0  ;;  %s1357_s22 = sshll.u32 %s337_s9, 4  ;;  %s1333_s8 = scalar_lea.sflag [#allocation4], %s2376_s0  ;;  %s2681_s22 = int_to_ptr.vmem [resolvable:$true] %s1357_s22 }
 0x5ff   : > { %s2053_s21 = scalar_lea.vmem %s2681_s22, 64  ;;  %s2167_s23 = smov [#allocation8]  }
 0x600   : > { %p2054_p10 = scmp.ne.s32.totalorder %s2681_s22, %s2053_s21  ;;  %s2057_s25 = sshll.u32 %s2167_s23, 4  ;;  %s2058_s25 = int_to_ptr.vmem [resolvable:$false] %s2057_s25 }
 0x601   : > { %s2059_s30 = scalar_lea.vmem %s2058_s25, 128  ;;  %p2060_p2 = scmp.lt.s32.totalorder %s2681_s22, %s2058_s25 }
 0x602   : > { %p2055_p11 = pnand %p2054_p10, %p2771_p6  ;;  %p2061_p4 = scmp.lt.s32.totalorder %s2059_s30, %s2053_s21 }
 0x604   : > { %v1295_v18 = vpop.permute.xlu1 %1294  ;;  %p2056_p0 = pneg %p2055_p11  ;;  %p2062_p5 = por %p2061_p4, %p2060_p2 }
 0x605   : > { %v1318_v22 = vsel %vm403_vm2, %v1317_v21, %v1295_v18 }
 0x606   : > { %p2063_p3 = pnand %p2062_p5, %p2056_p0 }
 0x60c   : > { %v1299_v19 = vpop.permute.xlu0 %1298 }
 0x60d   : > { %v1320_v24 = vsel %vm1319_vm5, %v1318_v22, %v1299_v19 }
 0x639   : > { %v1303_v20 = vpop.permute.xlu1 %1302 }
 0x63a   : > { %v1322_v26 = vsel %vm1321_vm6, %v1320_v24, %v1303_v20 }
 0x641   : > { %v1307_v23 = vpop.permute.xlu0 %1306 }
 0x642   : > { %v1324_v27 = vsel %vm1323_vm7, %v1322_v26, %v1307_v23 }
 0x657   : > { %v1311_v25 = vpop.permute.xlu1 %1310 }
 0x658   : > { %v1326_v28 = vsel %vm1325_vm8, %v1324_v27, %v1311_v25 }
 0x66f   : > { %v1315_v29 = vpop.permute.xlu0 %1314 }
 0x670   : > { %v1328_v30 = vsel %vm1327_vm9, %v1326_v28, %v1315_v29 }
 0x671   : > { %v1329_v45 = vpack.c.bf16 %v1328_v30, %v1328_v30 }
 0x673   : > { %1331 = vst.msk [vmem:[%s337_s9] sm:$0xf] %vm1330_vm10, %v1329_v45 }
 0x674   : > { %2066 = shalt.err (!%p2063_p3)
}
 0x675   : > { %s2067_s0 = scalar_lea.hbm %s2679_s16, 64  ;;  %s2071_s7 = scalar_lea.hbm %s2733_s3, 128 }
 0x676   : > { %p2068_p13 = scmp.ne.s32.totalorder %s2679_s16, %s2067_s0  ;;  %p2072_p1 = scmp.lt.u32.totalorder %s2679_s16, %s2733_s3 }
 0x677   : > { %p2073_p8 = scmp.lt.u32.totalorder %s2071_s7, %s2067_s0  ;;  %p2075_p10 = scmp.lt.u32.totalorder %s2067_s0, %s2679_s16 }
 0x678   : > { %p2069_p7 = pnand %p2068_p13, %p2771_p6 }
 0x679   : > { %p2074_p9 = por %p2073_p8, %p2072_p1 }
 0x67a   : > { %p2070_p12 = pneg %p2069_p7 }
 0x67b   : > { %p2076_p11 = por %p2075_p10, %p2074_p9 }
 0x67d   : > { %p2077_p0 = pnand %p2076_p11, %p2070_p12 }
 0x67f   : > { %2080 = shalt.err (!%p2077_p0)
}
 0x680   : > { %1777 = dma.vmem_to_hbm [thread:$0]  (%p2771_p6), %s2681_s22, 64, %s2679_s16, %s1333_s8  }
 0x681 PF: > { %s2772_s28 = sld [smem:[#allocation21_spill]]  ;;  %s2773_s14 = sld [smem:[#allocation18_spill]] }
 0x682   : > { %s1403_s20 = sand.u32 1, %s2123_s18  }
 0x683   : > { %s1404_s24 = scalar_lea.sflag [#allocation4], %s1403_s20 }
 0x687   : > { %p2774_p2 = scmp.ne.s32.totalorder %s2772_s28, 0  ;;  %p2775_p4 = scmp.ge.s32.totalorder %s2773_s14, 2 }
 0x689   : > { %p1794_p5 = pnand %p2775_p4, %p2774_p2 }
 0x68b   : > { %2114 = dma.done.wait (!%p1794_p5), %s1404_s24, 64  }
 0x68c   : > { %2116 = vsyncadd (!%p1794_p5), %s1404_s24, 4294967232  ;;  %s2776_s12 = sadd.s32 4294967294, %s2773_s14  }
 0x68d   : > { %s1412_s13 = sand.u32 1, %s2776_s12  }
 0x68e   : > { %s1413_s1 = scalar_lea.sflag [#allocation10], %s1412_s13 }
 0x68f   : > { %2118 = dma.done.wait (!%p1794_p5), %s1413_s1, 1024  }
 0x690   : > { %2120 = vsyncadd (!%p1794_p5), %s1413_s1, 4294966272  ;;  %s28_s23 = sadd.s32 1, %s2773_s14   ;;  %s2777_s6 = sld [smem:[#allocation16_spill]] }
 0x691   : > { %p25_p6 = scmp.ge.s32.totalorder %s28_s23, 4   ;;  %s2778_s20 = sld [smem:[#allocation20_spill]] }
 0x692   : > { %s2779_s21 = sld [smem:[#allocation17_spill]]  ;;  %s2780_s22 = sld [smem:[#allocation19_spill]] }
 0x693   : > { %s2781_s18 = smov %s2127_s19  ;;  %27 = sbr.rel (!%p25_p6) target bundleno = 13 (0xd), region = 147 }
 0x696   : > { %s2782_s19 = smov %s2777_s6 }
 0x69a   :  { %1427 = vsyncpa [#allocation3], 1 }
 0x69b   :  { %1429 = vsyncpa [#allocation3 + $0x1], 1 }
 0x69c   :  { %1430 = vsyncpa [#allocation6], 1 }
 0x69d   :  { %1432 = vsyncpa [#allocation6 + $0x1], 1 }
 0x69e   :  { %1433 = vsyncpa [#allocation4], 1 }
 0x69f   :  { %1435 = vsyncpa [#allocation4 + $0x1], 1 }
 0x6a0   :  { %1436 = vsyncpa [#allocation10], 1 }
 0x6a1   :  { %1438 = vsyncpa [#allocation10 + $0x1], 1 }

</bundles_post_ra>
